<compile_context>
chip_gen: v6e
topology: v6e:2x2x1
jax: 0.10.0
libtpu: 0.0.40
codegen_flags: <defaults>
</compile_context>

<pallas_src>
import functools

import jax
import jax.numpy as jnp
from jax import lax
from jax.experimental import pallas as pl
from jax.experimental.pallas import tpu as pltpu


# -----------------------------------------------------------------------------
# Pallas kernel: 2-layer GRU recurrence (layer-by-layer) + MLP head, one invocation.
# -----------------------------------------------------------------------------
def _gru_mlp_kernel(
    x2d_ref,    # (T*Bp, I)      time-major input, batch padded to Bp, flattened
    w_ref,      # (I + 5H, 3H)   packed: wih1 | whh1 | wih2 | whh2 | wfc1 | wfc2
    b_ref,      # (8, 3H)        packed: bgi1, bgi2, bhn1, bhn2, bfc1, bfc2, 0, 0
    out_ref,    # (B, 1)
    gi_scr,     # (T*Bp, 3H)     VMEM scratch: gate-input projections (reused per layer)
    h1_scr,     # (T*Bp, H)      VMEM scratch: layer-0 hidden states for all timesteps
    *, seq_len, batch, batch_pad, input_size, hidden_size,
):
    T, B, Bp, I, H = seq_len, batch, batch_pad, input_size, hidden_size

    def gru_update(gi, gh, h_prev, b_hn):
        # PyTorch gate order: r, z, n.  gi carries bih (+ bhh folded for r/z);
        # gh has no bias; b_hn = bhh_n (must be multiplied by r).
        i_r, i_z, i_n = gi[:, 0:H], gi[:, H:2 * H], gi[:, 2 * H:3 * H]
        h_r, h_z, h_n = gh[:, 0:H], gh[:, H:2 * H], gh[:, 2 * H:3 * H]
        r = jax.nn.sigmoid(i_r + h_r)
        z = jax.nn.sigmoid(i_z + h_z)
        n = jnp.tanh(i_n + r * (h_n + b_hn))
        return (1.0 - z) * n + z * h_prev

    # ---------------- Layer 0 ----------------
    # Hoisted input projection for all timesteps: one MXU pass, off the serial chain.
    gi_scr[...] = (jnp.dot(x2d_ref[...], w_ref[0:I, :],
                           preferred_element_type=jnp.float32) + b_ref[0:1, :])

    whh1 = w_ref[I:I + H, :]          # only recurrent weight live in this loop
    bhn1 = b_ref[2:3, 0:H]
    h1 = jnp.zeros((Bp, H), jnp.float32)
    for t in range(T):                # T small & static -> full unroll, aligned slices
        gh1 = jnp.dot(h1, whh1, preferred_element_type=jnp.float32)
        h1 = gru_update(gi_scr[t * Bp:(t + 1) * Bp, :], gh1, h1, bhn1)
        h1_scr[t * Bp:(t + 1) * Bp, :] = h1

    # ---------------- Layer 1 ----------------
    # Layer-1 input projection for all timesteps in ONE matmul (gi scratch reused).
    gi_scr[...] = (jnp.dot(h1_scr[...], w_ref[I + H:I + 2 * H, :],
                           preferred_element_type=jnp.float32) + b_ref[1:2, :])

    whh2 = w_ref[I + 2 * H:I + 3 * H, :]
    bhn2 = b_ref[3:4, 0:H]
    h2 = jnp.zeros((Bp, H), jnp.float32)
    for t in range(T):
        gh2 = jnp.dot(h2, whh2, preferred_element_type=jnp.float32)
        h2 = gru_update(gi_scr[t * Bp:(t + 1) * Bp, :], gh2, h2, bhn2)

    # ---------------- FC head ----------------
    y = (jnp.dot(h2, w_ref[I + 3 * H:I + 4 * H, 0:H],
                 preferred_element_type=jnp.float32) + b_ref[4:5, 0:H])
    y = jnp.maximum(y, 0.0)
    res = (jnp.dot(y, w_ref[I + 4 * H:I + 5 * H, 0:1],
                   preferred_element_type=jnp.float32) + b_ref[5:6, 0:1])
    out_ref[...] = res[0:B, :]        # only the real batch rows


# -----------------------------------------------------------------------------
# One-time parameter packing (weight slab + bias slab), biases pre-folded.
# -----------------------------------------------------------------------------
def pack_params(params):
    H = params["wfc1"].shape[0]
    G = 3 * H

    def pad_cols(w):
        return jnp.pad(w, ((0, 0), (0, G - w.shape[1])))

    # Weight slab rows: wih1(I) | whh1(H) | wih2(H) | whh2(H) | wfc1(H) | wfc2(H).
    w_slab = jnp.concatenate(
        [params["wih1"], params["whh1"], params["wih2"], params["whh2"],
         pad_cols(params["wfc1"]), pad_cols(params["wfc2"])],
        axis=0).astype(jnp.float32)

    # Fold biases: r/z gates take bih+bhh in one shot (on the gi side); the n-gate
    # keeps bih_n on gi and bhh_n separate (it must be multiplied by r).
    def fold_biases(bih, bhh):
        b_gi = jnp.concatenate([bih[:, :2 * H] + bhh[:, :2 * H], bih[:, 2 * H:]], axis=1)
        b_hn = bhh[:, 2 * H:]
        return b_gi, b_hn

    bgi1, bhn1 = fold_biases(params["bih1"], params["bhh1"])
    bgi2, bhn2 = fold_biases(params["bih2"], params["bhh2"])

    # Bias slab rows: 0 bgi1 | 1 bgi2 | 2 bhn1 | 3 bhn2 | 4 bfc1 | 5 bfc2 | 6,7 zeros.
    b_slab = jnp.concatenate(
        [pad_cols(bgi1), pad_cols(bgi2), pad_cols(bhn1), pad_cols(bhn2),
         pad_cols(params["bfc1"]), pad_cols(params["bfc2"]),
         jnp.zeros((2, G), jnp.float32)],
        axis=0).astype(jnp.float32)

    return w_slab, b_slab


def recurrent_forward(x, w_slab, b_slab):
    """x: (T, B, I) float32; packed slabs from pack_params. Returns (B, 1) float32."""
    T, B, I = x.shape
    H = b_slab.shape[1] // 3
    Bp = max(8, ((B + 7) // 8) * 8)   # sublane-align the batch rows

    # Pad batch with zero rows (row-independent recurrence -> no cross-contamination),
    # flatten time into rows so the layer-0 projection is one matmul.
    x2d = jnp.pad(x, ((0, 0), (0, Bp - B), (0, 0))).reshape(T * Bp, I)

    kernel = functools.partial(_gru_mlp_kernel, seq_len=T, batch=B, batch_pad=Bp,
                               input_size=I, hidden_size=H)
    vmem = lambda: pl.BlockSpec(memory_space=pltpu.MemorySpace.VMEM)

    # No grid: single invocation, all operands resident in VMEM (~120 KB total),
    # far under even v7x's 64 MiB.  Tiling/pipelining would only add per-step overhead.
    return pl.pallas_call(
        kernel,
        out_shape=jax.ShapeDtypeStruct((B, 1), jnp.float32),
        in_specs=[vmem(), vmem(), vmem()],
        out_specs=vmem(),
        scratch_shapes=[
            pltpu.VMEM((T * Bp, 3 * H), jnp.float32),   # gate-input projections
            pltpu.VMEM((T * Bp, H), jnp.float32),       # layer-0 hidden states
        ],
    )(x2d, w_slab, b_slab)


# -----------------------------------------------------------------------------
# Pure-JAX reference (same math, lax.scan, original un-folded biases).
# -----------------------------------------------------------------------------
def reference_forward(x, params):
    H = params["wfc1"].shape[0]

    def cell(inp, h_prev, wih, whh, bih, bhh):
        gi = inp @ wih + bih
        gh = h_prev @ whh + bhh
        i_r, i_z, i_n = gi[:, :H], gi[:, H:2 * H], gi[:, 2 * H:]
        h_r, h_z, h_n = gh[:, :H], gh[:, H:2 * H], gh[:, 2 * H:]
        r = jax.nn.sigmoid(i_r + h_r)
        z = jax.nn.sigmoid(i_z + h_z)
        n = jnp.tanh(i_n + r * h_n)
        return (1.0 - z) * n + z * h_prev

    B = x.shape[1]
    h1 = jnp.zeros((B, H), jnp.float32)
    h2 = jnp.zeros((B, H), jnp.float32)

    def step(carry, x_t):
        h1, h2 = carry
        h1 = cell(x_t, h1, params["wih1"], params["whh1"], params["bih1"], params["bhh1"])
        h2 = cell(h1, h2, params["wih2"], params["whh2"], params["bih2"], params["bhh2"])
        return (h1, h2), None

    (h1, h2), _ = lax.scan(step, (h1, h2), x)
    y = jnp.maximum(h2 @ params["wfc1"] + params["bfc1"], 0.0)
    return y @ params["wfc2"] + params["bfc2"]


# -----------------------------------------------------------------------------
# Deterministic parameter initialization (shapes match nn.GRU / nn.Linear,
# stored pre-transposed for row-major matmul inside the kernel).
# -----------------------------------------------------------------------------
def init_params(key, input_size, hidden_size):
    H, I = hidden_size, input_size
    k = 1.0 / jnp.sqrt(jnp.float32(H))
    keys = jax.random.split(key, 12)
    u = lambda kk, shape: jax.random.uniform(kk, shape, jnp.float32, -k, k)

    return {
        # GRU layer 0: weight_ih_l0 (3H, I) -> transposed (I, 3H), etc.
        "wih1": u(keys[0], (I, 3 * H)),
        "whh1": u(keys[1], (H, 3 * H)),
        "bih1": u(keys[2], (1, 3 * H)),
        "bhh1": u(keys[3], (1, 3 * H)),
        # GRU layer 1 (input is previous layer's hidden state)
        "wih2": u(keys[4], (H, 3 * H)),
        "whh2": u(keys[5], (H, 3 * H)),
        "bih2": u(keys[6], (1, 3 * H)),
        "bhh2": u(keys[7], (1, 3 * H)),
        # fc1: (H, H) -> transposed (H, H); fc2: (1, H) -> transposed (H, 1)
        "wfc1": u(keys[8], (H, H)),
        "bfc1": u(keys[9], (1, H)),
        "wfc2": u(keys[10], (H, 1)),
        "bfc2": u(keys[11], (1, 1)),
    }


if __name__ == "__main__":
    # Small shapes consistent with the module (time-major GRU input).
    SEQ, BATCH, INPUT, HIDDEN = 8, 2, 64, 32

    key = jax.random.PRNGKey(0)
    k_x, k_p = jax.random.split(key)
    x = jax.random.normal(k_x, (SEQ, BATCH, INPUT), jnp.float32)
    params = init_params(k_p, INPUT, HIDDEN)

    # One-time packing (kept out of the per-call path).
    w_slab, b_slab = pack_params(params)
    w_slab = jax.block_until_ready(w_slab)
    b_slab = jax.block_until_ready(b_slab)

    out = recurrent_forward(x, w_slab, b_slab)
    out = jax.block_until_ready(out)

    ref = jax.block_until_ready(reference_forward(x, params))
    assert out.shape == (BATCH, 1), out.shape
    assert jnp.allclose(out, ref, atol=1e-4, rtol=1e-4), (out, ref)

    print("KERNEL_OK")
</pallas_src>

<mosaic_0001>
module attributes {stable_mosaic.version = 11 : i64} {
  func.func @_gru_mlp_kernel(%arg0: memref<64x64xf32, #tpu.memory_space<vmem>>, %arg1: memref<224x96xf32, #tpu.memory_space<vmem>>, %arg2: memref<8x96xf32, #tpu.memory_space<vmem>>, %arg3: memref<2x1xf32, #tpu.memory_space<vmem>>, %arg4: memref<64x96xf32, #tpu.memory_space<vmem>>, %arg5: memref<64x32xf32, #tpu.memory_space<vmem>>) attributes {dimension_semantics = [], scalar_prefetch = 0 : i64, scratch_operands = 2 : i64, tpu.core_type = #tpu.core_type<tc>} {
    %c0 = arith.constant 0 : index
    %c0_0 = arith.constant 0 : index
    %0 = vector.load %arg0[%c0, %c0_0] : memref<64x64xf32, #tpu.memory_space<vmem>>, vector<64x64xf32>
    %c0_1 = arith.constant 0 : index
    %c0_2 = arith.constant 0 : index
    %1 = vector.load %arg1[%c0_1, %c0_2] : memref<224x96xf32, #tpu.memory_space<vmem>>, vector<64x96xf32>
    %cst = arith.constant dense<0.000000e+00> : vector<64x96xf32>
    %2 = tpu.matmul %0, %1, %cst {dimension_numbers = #tpu.dot_dimension_numbers<[1], [0], [0], [1], [0, 0, 1, 1], [], []>} : vector<64x64xf32>, vector<64x96xf32>, vector<64x96xf32> -> vector<64x96xf32>
    %c0_3 = arith.constant 0 : index
    %c0_4 = arith.constant 0 : index
    %3 = vector.load %arg2[%c0_3, %c0_4] : memref<8x96xf32, #tpu.memory_space<vmem>>, vector<1x96xf32>
    %4 = vector.broadcast %3 : vector<1x96xf32> to vector<64x96xf32>
    %5 = arith.addf %2, %4 : vector<64x96xf32>
    %c0_5 = arith.constant 0 : index
    %c0_6 = arith.constant 0 : index
    %6 = vector.load %arg4[%c0_5, %c0_6] : memref<64x96xf32, #tpu.memory_space<vmem>>, vector<64x96xf32>
    tpu.vector_store %arg4[%c0_5, %c0_6], %5 {strides = array<i32>} : memref<64x96xf32, #tpu.memory_space<vmem>>, vector<64x96xf32>,
    %c64 = arith.constant 64 : index
    %c0_7 = arith.constant 0 : index
    %7 = vector.load %arg1[%c64, %c0_7] : memref<224x96xf32, #tpu.memory_space<vmem>>, vector<32x96xf32>
    %c2 = arith.constant 2 : index
    %c0_8 = arith.constant 0 : index
    %8 = vector.load %arg2[%c2, %c0_8] : memref<8x96xf32, #tpu.memory_space<vmem>>, vector<1x32xf32>
    %cst_9 = arith.constant 0.000000e+00 : f32
    %9 = vector.broadcast %cst_9 : f32 to vector<8x32xf32>
    %cst_10 = arith.constant dense<0.000000e+00> : vector<8x96xf32>
    %10 = tpu.matmul %9, %7, %cst_10 {dimension_numbers = #tpu.dot_dimension_numbers<[1], [0], [0], [1], [0, 0, 1, 1], [], []>} : vector<8x32xf32>, vector<32x96xf32>, vector<8x96xf32> -> vector<8x96xf32>
    %c0_11 = arith.constant 0 : index
    %c0_12 = arith.constant 0 : index
    %11 = vector.load %arg4[%c0_11, %c0_12] : memref<64x96xf32, #tpu.memory_space<vmem>>, vector<8x96xf32>
    %12 = vector.extract_strided_slice %11 {offsets = [0, 0], sizes = [8, 32], strides = [1, 1]} : vector<8x96xf32> to vector<8x32xf32>
    %13 = vector.extract_strided_slice %11 {offsets = [0, 32], sizes = [8, 32], strides = [1, 1]} : vector<8x96xf32> to vector<8x32xf32>
    %14 = vector.extract_strided_slice %11 {offsets = [0, 64], sizes = [8, 32], strides = [1, 1]} : vector<8x96xf32> to vector<8x32xf32>
    %15 = vector.extract_strided_slice %10 {offsets = [0, 0], sizes = [8, 32], strides = [1, 1]} : vector<8x96xf32> to vector<8x32xf32>
    %16 = vector.extract_strided_slice %10 {offsets = [0, 32], sizes = [8, 32], strides = [1, 1]} : vector<8x96xf32> to vector<8x32xf32>
    %17 = vector.extract_strided_slice %10 {offsets = [0, 64], sizes = [8, 32], strides = [1, 1]} : vector<8x96xf32> to vector<8x32xf32>
    %18 = arith.addf %12, %15 : vector<8x32xf32>
    %19 = arith.negf %18 : vector<8x32xf32>
    %20 = math.exp %19 : vector<8x32xf32>
    %cst_13 = arith.constant 1.000000e+00 : f32
    %21 = vector.broadcast %cst_13 : f32 to vector<8x32xf32>
    %22 = arith.addf %21, %20 : vector<8x32xf32>
    %23 = arith.divf %21, %22 : vector<8x32xf32>
    %24 = arith.addf %13, %16 : vector<8x32xf32>
    %25 = arith.negf %24 : vector<8x32xf32>
    %26 = math.exp %25 : vector<8x32xf32>
    %cst_14 = arith.constant 1.000000e+00 : f32
    %27 = vector.broadcast %cst_14 : f32 to vector<8x32xf32>
    %28 = arith.addf %27, %26 : vector<8x32xf32>
    %29 = arith.divf %27, %28 : vector<8x32xf32>
    %30 = vector.broadcast %8 : vector<1x32xf32> to vector<8x32xf32>
    %31 = arith.addf %17, %30 : vector<8x32xf32>
    %32 = arith.mulf %23, %31 : vector<8x32xf32>
    %33 = arith.addf %14, %32 : vector<8x32xf32>
    %34 = math.tanh %33 : vector<8x32xf32>
    %cst_15 = arith.constant 1.000000e+00 : f32
    %35 = vector.broadcast %cst_15 : f32 to vector<8x32xf32>
    %36 = arith.subf %35, %29 : vector<8x32xf32>
    %37 = arith.mulf %36, %34 : vector<8x32xf32>
    %38 = arith.mulf %29, %9 : vector<8x32xf32>
    %39 = arith.addf %37, %38 : vector<8x32xf32>
    %c0_16 = arith.constant 0 : index
    %c0_17 = arith.constant 0 : index
    %40 = vector.load %arg5[%c0_16, %c0_17] : memref<64x32xf32, #tpu.memory_space<vmem>>, vector<8x32xf32>
    tpu.vector_store %arg5[%c0_16, %c0_17], %39 {strides = array<i32>} : memref<64x32xf32, #tpu.memory_space<vmem>>, vector<8x32xf32>,
    %cst_18 = arith.constant dense<0.000000e+00> : vector<8x96xf32>
    %41 = tpu.matmul %39, %7, %cst_18 {dimension_numbers = #tpu.dot_dimension_numbers<[1], [0], [0], [1], [0, 0, 1, 1], [], []>} : vector<8x32xf32>, vector<32x96xf32>, vector<8x96xf32> -> vector<8x96xf32>
    %c8 = arith.constant 8 : index
    %c0_19 = arith.constant 0 : index
    %42 = vector.load %arg4[%c8, %c0_19] : memref<64x96xf32, #tpu.memory_space<vmem>>, vector<8x96xf32>
    %43 = vector.extract_strided_slice %42 {offsets = [0, 0], sizes = [8, 32], strides = [1, 1]} : vector<8x96xf32> to vector<8x32xf32>
    %44 = vector.extract_strided_slice %42 {offsets = [0, 32], sizes = [8, 32], strides = [1, 1]} : vector<8x96xf32> to vector<8x32xf32>
    %45 = vector.extract_strided_slice %42 {offsets = [0, 64], sizes = [8, 32], strides = [1, 1]} : vector<8x96xf32> to vector<8x32xf32>
    %46 = vector.extract_strided_slice %41 {offsets = [0, 0], sizes = [8, 32], strides = [1, 1]} : vector<8x96xf32> to vector<8x32xf32>
    %47 = vector.extract_strided_slice %41 {offsets = [0, 32], sizes = [8, 32], strides = [1, 1]} : vector<8x96xf32> to vector<8x32xf32>
    %48 = vector.extract_strided_slice %41 {offsets = [0, 64], sizes = [8, 32], strides = [1, 1]} : vector<8x96xf32> to vector<8x32xf32>
    %49 = arith.addf %43, %46 : vector<8x32xf32>
    %50 = arith.negf %49 : vector<8x32xf32>
    %51 = math.exp %50 : vector<8x32xf32>
    %cst_20 = arith.constant 1.000000e+00 : f32
    %52 = vector.broadcast %cst_20 : f32 to vector<8x32xf32>
    %53 = arith.addf %52, %51 : vector<8x32xf32>
    %54 = arith.divf %52, %53 : vector<8x32xf32>
    %55 = arith.addf %44, %47 : vector<8x32xf32>
    %56 = arith.negf %55 : vector<8x32xf32>
    %57 = math.exp %56 : vector<8x32xf32>
    %cst_21 = arith.constant 1.000000e+00 : f32
    %58 = vector.broadcast %cst_21 : f32 to vector<8x32xf32>
    %59 = arith.addf %58, %57 : vector<8x32xf32>
    %60 = arith.divf %58, %59 : vector<8x32xf32>
    %61 = vector.broadcast %8 : vector<1x32xf32> to vector<8x32xf32>
    %62 = arith.addf %48, %61 : vector<8x32xf32>
    %63 = arith.mulf %54, %62 : vector<8x32xf32>
    %64 = arith.addf %45, %63 : vector<8x32xf32>
    %65 = math.tanh %64 : vector<8x32xf32>
    %cst_22 = arith.constant 1.000000e+00 : f32
    %66 = vector.broadcast %cst_22 : f32 to vector<8x32xf32>
    %67 = arith.subf %66, %60 : vector<8x32xf32>
    %68 = arith.mulf %67, %65 : vector<8x32xf32>
    %69 = arith.mulf %60, %39 : vector<8x32xf32>
    %70 = arith.addf %68, %69 : vector<8x32xf32>
    %c8_23 = arith.constant 8 : index
    %c0_24 = arith.constant 0 : index
    %71 = vector.load %arg5[%c8_23, %c0_24] : memref<64x32xf32, #tpu.memory_space<vmem>>, vector<8x32xf32>
    tpu.vector_store %arg5[%c8_23, %c0_24], %70 {strides = array<i32>} : memref<64x32xf32, #tpu.memory_space<vmem>>, vector<8x32xf32>,
    %cst_25 = arith.constant dense<0.000000e+00> : vector<8x96xf32>
    %72 = tpu.matmul %70, %7, %cst_25 {dimension_numbers = #tpu.dot_dimension_numbers<[1], [0], [0], [1], [0, 0, 1, 1], [], []>} : vector<8x32xf32>, vector<32x96xf32>, vector<8x96xf32> -> vector<8x96xf32>
    %c16 = arith.constant 16 : index
    %c0_26 = arith.constant 0 : index
    %73 = vector.load %arg4[%c16, %c0_26] : memref<64x96xf32, #tpu.memory_space<vmem>>, vector<8x96xf32>
    %74 = vector.extract_strided_slice %73 {offsets = [0, 0], sizes = [8, 32], strides = [1, 1]} : vector<8x96xf32> to vector<8x32xf32>
    %75 = vector.extract_strided_slice %73 {offsets = [0, 32], sizes = [8, 32], strides = [1, 1]} : vector<8x96xf32> to vector<8x32xf32>
    %76 = vector.extract_strided_slice %73 {offsets = [0, 64], sizes = [8, 32], strides = [1, 1]} : vector<8x96xf32> to vector<8x32xf32>
    %77 = vector.extract_strided_slice %72 {offsets = [0, 0], sizes = [8, 32], strides = [1, 1]} : vector<8x96xf32> to vector<8x32xf32>
    %78 = vector.extract_strided_slice %72 {offsets = [0, 32], sizes = [8, 32], strides = [1, 1]} : vector<8x96xf32> to vector<8x32xf32>
    %79 = vector.extract_strided_slice %72 {offsets = [0, 64], sizes = [8, 32], strides = [1, 1]} : vector<8x96xf32> to vector<8x32xf32>
    %80 = arith.addf %74, %77 : vector<8x32xf32>
    %81 = arith.negf %80 : vector<8x32xf32>
    %82 = math.exp %81 : vector<8x32xf32>
    %cst_27 = arith.constant 1.000000e+00 : f32
    %83 = vector.broadcast %cst_27 : f32 to vector<8x32xf32>
    %84 = arith.addf %83, %82 : vector<8x32xf32>
    %85 = arith.divf %83, %84 : vector<8x32xf32>
    %86 = arith.addf %75, %78 : vector<8x32xf32>
    %87 = arith.negf %86 : vector<8x32xf32>
    %88 = math.exp %87 : vector<8x32xf32>
    %cst_28 = arith.constant 1.000000e+00 : f32
    %89 = vector.broadcast %cst_28 : f32 to vector<8x32xf32>
    %90 = arith.addf %89, %88 : vector<8x32xf32>
    %91 = arith.divf %89, %90 : vector<8x32xf32>
    %92 = vector.broadcast %8 : vector<1x32xf32> to vector<8x32xf32>
    %93 = arith.addf %79, %92 : vector<8x32xf32>
    %94 = arith.mulf %85, %93 : vector<8x32xf32>
    %95 = arith.addf %76, %94 : vector<8x32xf32>
    %96 = math.tanh %95 : vector<8x32xf32>
    %cst_29 = arith.constant 1.000000e+00 : f32
    %97 = vector.broadcast %cst_29 : f32 to vector<8x32xf32>
    %98 = arith.subf %97, %91 : vector<8x32xf32>
    %99 = arith.mulf %98, %96 : vector<8x32xf32>
    %100 = arith.mulf %91, %70 : vector<8x32xf32>
    %101 = arith.addf %99, %100 : vector<8x32xf32>
    %c16_30 = arith.constant 16 : index
    %c0_31 = arith.constant 0 : index
    %102 = vector.load %arg5[%c16_30, %c0_31] : memref<64x32xf32, #tpu.memory_space<vmem>>, vector<8x32xf32>
    tpu.vector_store %arg5[%c16_30, %c0_31], %101 {strides = array<i32>} : memref<64x32xf32, #tpu.memory_space<vmem>>, vector<8x32xf32>,
    %cst_32 = arith.constant dense<0.000000e+00> : vector<8x96xf32>
    %103 = tpu.matmul %101, %7, %cst_32 {dimension_numbers = #tpu.dot_dimension_numbers<[1], [0], [0], [1], [0, 0, 1, 1], [], []>} : vector<8x32xf32>, vector<32x96xf32>, vector<8x96xf32> -> vector<8x96xf32>
    %c24 = arith.constant 24 : index
    %c0_33 = arith.constant 0 : index
    %104 = vector.load %arg4[%c24, %c0_33] : memref<64x96xf32, #tpu.memory_space<vmem>>, vector<8x96xf32>
    %105 = vector.extract_strided_slice %104 {offsets = [0, 0], sizes = [8, 32], strides = [1, 1]} : vector<8x96xf32> to vector<8x32xf32>
    %106 = vector.extract_strided_slice %104 {offsets = [0, 32], sizes = [8, 32], strides = [1, 1]} : vector<8x96xf32> to vector<8x32xf32>
    %107 = vector.extract_strided_slice %104 {offsets = [0, 64], sizes = [8, 32], strides = [1, 1]} : vector<8x96xf32> to vector<8x32xf32>
    %108 = vector.extract_strided_slice %103 {offsets = [0, 0], sizes = [8, 32], strides = [1, 1]} : vector<8x96xf32> to vector<8x32xf32>
    %109 = vector.extract_strided_slice %103 {offsets = [0, 32], sizes = [8, 32], strides = [1, 1]} : vector<8x96xf32> to vector<8x32xf32>
    %110 = vector.extract_strided_slice %103 {offsets = [0, 64], sizes = [8, 32], strides = [1, 1]} : vector<8x96xf32> to vector<8x32xf32>
    %111 = arith.addf %105, %108 : vector<8x32xf32>
    %112 = arith.negf %111 : vector<8x32xf32>
    %113 = math.exp %112 : vector<8x32xf32>
    %cst_34 = arith.constant 1.000000e+00 : f32
    %114 = vector.broadcast %cst_34 : f32 to vector<8x32xf32>
    %115 = arith.addf %114, %113 : vector<8x32xf32>
    %116 = arith.divf %114, %115 : vector<8x32xf32>
    %117 = arith.addf %106, %109 : vector<8x32xf32>
    %118 = arith.negf %117 : vector<8x32xf32>
    %119 = math.exp %118 : vector<8x32xf32>
    %cst_35 = arith.constant 1.000000e+00 : f32
    %120 = vector.broadcast %cst_35 : f32 to vector<8x32xf32>
    %121 = arith.addf %120, %119 : vector<8x32xf32>
    %122 = arith.divf %120, %121 : vector<8x32xf32>
    %123 = vector.broadcast %8 : vector<1x32xf32> to vector<8x32xf32>
    %124 = arith.addf %110, %123 : vector<8x32xf32>
    %125 = arith.mulf %116, %124 : vector<8x32xf32>
    %126 = arith.addf %107, %125 : vector<8x32xf32>
    %127 = math.tanh %126 : vector<8x32xf32>
    %cst_36 = arith.constant 1.000000e+00 : f32
    %128 = vector.broadcast %cst_36 : f32 to vector<8x32xf32>
    %129 = arith.subf %128, %122 : vector<8x32xf32>
    %130 = arith.mulf %129, %127 : vector<8x32xf32>
    %131 = arith.mulf %122, %101 : vector<8x32xf32>
    %132 = arith.addf %130, %131 : vector<8x32xf32>
    %c24_37 = arith.constant 24 : index
    %c0_38 = arith.constant 0 : index
    %133 = vector.load %arg5[%c24_37, %c0_38] : memref<64x32xf32, #tpu.memory_space<vmem>>, vector<8x32xf32>
    tpu.vector_store %arg5[%c24_37, %c0_38], %132 {strides = array<i32>} : memref<64x32xf32, #tpu.memory_space<vmem>>, vector<8x32xf32>,
    %cst_39 = arith.constant dense<0.000000e+00> : vector<8x96xf32>
    %134 = tpu.matmul %132, %7, %cst_39 {dimension_numbers = #tpu.dot_dimension_numbers<[1], [0], [0], [1], [0, 0, 1, 1], [], []>} : vector<8x32xf32>, vector<32x96xf32>, vector<8x96xf32> -> vector<8x96xf32>
    %c32 = arith.constant 32 : index
    %c0_40 = arith.constant 0 : index
    %135 = vector.load %arg4[%c32, %c0_40] : memref<64x96xf32, #tpu.memory_space<vmem>>, vector<8x96xf32>
    %136 = vector.extract_strided_slice %135 {offsets = [0, 0], sizes = [8, 32], strides = [1, 1]} : vector<8x96xf32> to vector<8x32xf32>
    %137 = vector.extract_strided_slice %135 {offsets = [0, 32], sizes = [8, 32], strides = [1, 1]} : vector<8x96xf32> to vector<8x32xf32>
    %138 = vector.extract_strided_slice %135 {offsets = [0, 64], sizes = [8, 32], strides = [1, 1]} : vector<8x96xf32> to vector<8x32xf32>
    %139 = vector.extract_strided_slice %134 {offsets = [0, 0], sizes = [8, 32], strides = [1, 1]} : vector<8x96xf32> to vector<8x32xf32>
    %140 = vector.extract_strided_slice %134 {offsets = [0, 32], sizes = [8, 32], strides = [1, 1]} : vector<8x96xf32> to vector<8x32xf32>
    %141 = vector.extract_strided_slice %134 {offsets = [0, 64], sizes = [8, 32], strides = [1, 1]} : vector<8x96xf32> to vector<8x32xf32>
    %142 = arith.addf %136, %139 : vector<8x32xf32>
    %143 = arith.negf %142 : vector<8x32xf32>
    %144 = math.exp %143 : vector<8x32xf32>
    %cst_41 = arith.constant 1.000000e+00 : f32
    %145 = vector.broadcast %cst_41 : f32 to vector<8x32xf32>
    %146 = arith.addf %145, %144 : vector<8x32xf32>
    %147 = arith.divf %145, %146 : vector<8x32xf32>
    %148 = arith.addf %137, %140 : vector<8x32xf32>
    %149 = arith.negf %148 : vector<8x32xf32>
    %150 = math.exp %149 : vector<8x32xf32>
    %cst_42 = arith.constant 1.000000e+00 : f32
    %151 = vector.broadcast %cst_42 : f32 to vector<8x32xf32>
    %152 = arith.addf %151, %150 : vector<8x32xf32>
    %153 = arith.divf %151, %152 : vector<8x32xf32>
    %154 = vector.broadcast %8 : vector<1x32xf32> to vector<8x32xf32>
    %155 = arith.addf %141, %154 : vector<8x32xf32>
    %156 = arith.mulf %147, %155 : vector<8x32xf32>
    %157 = arith.addf %138, %156 : vector<8x32xf32>
    %158 = math.tanh %157 : vector<8x32xf32>
    %cst_43 = arith.constant 1.000000e+00 : f32
    %159 = vector.broadcast %cst_43 : f32 to vector<8x32xf32>
    %160 = arith.subf %159, %153 : vector<8x32xf32>
    %161 = arith.mulf %160, %158 : vector<8x32xf32>
    %162 = arith.mulf %153, %132 : vector<8x32xf32>
    %163 = arith.addf %161, %162 : vector<8x32xf32>
    %c32_44 = arith.constant 32 : index
    %c0_45 = arith.constant 0 : index
    %164 = vector.load %arg5[%c32_44, %c0_45] : memref<64x32xf32, #tpu.memory_space<vmem>>, vector<8x32xf32>
    tpu.vector_store %arg5[%c32_44, %c0_45], %163 {strides = array<i32>} : memref<64x32xf32, #tpu.memory_space<vmem>>, vector<8x32xf32>,
    %cst_46 = arith.constant dense<0.000000e+00> : vector<8x96xf32>
    %165 = tpu.matmul %163, %7, %cst_46 {dimension_numbers = #tpu.dot_dimension_numbers<[1], [0], [0], [1], [0, 0, 1, 1], [], []>} : vector<8x32xf32>, vector<32x96xf32>, vector<8x96xf32> -> vector<8x96xf32>
    %c40 = arith.constant 40 : index
    %c0_47 = arith.constant 0 : index
    %166 = vector.load %arg4[%c40, %c0_47] : memref<64x96xf32, #tpu.memory_space<vmem>>, vector<8x96xf32>
    %167 = vector.extract_strided_slice %166 {offsets = [0, 0], sizes = [8, 32], strides = [1, 1]} : vector<8x96xf32> to vector<8x32xf32>
    %168 = vector.extract_strided_slice %166 {offsets = [0, 32], sizes = [8, 32], strides = [1, 1]} : vector<8x96xf32> to vector<8x32xf32>
    %169 = vector.extract_strided_slice %166 {offsets = [0, 64], sizes = [8, 32], strides = [1, 1]} : vector<8x96xf32> to vector<8x32xf32>
    %170 = vector.extract_strided_slice %165 {offsets = [0, 0], sizes = [8, 32], strides = [1, 1]} : vector<8x96xf32> to vector<8x32xf32>
    %171 = vector.extract_strided_slice %165 {offsets = [0, 32], sizes = [8, 32], strides = [1, 1]} : vector<8x96xf32> to vector<8x32xf32>
    %172 = vector.extract_strided_slice %165 {offsets = [0, 64], sizes = [8, 32], strides = [1, 1]} : vector<8x96xf32> to vector<8x32xf32>
    %173 = arith.addf %167, %170 : vector<8x32xf32>
    %174 = arith.negf %173 : vector<8x32xf32>
    %175 = math.exp %174 : vector<8x32xf32>
    %cst_48 = arith.constant 1.000000e+00 : f32
    %176 = vector.broadcast %cst_48 : f32 to vector<8x32xf32>
    %177 = arith.addf %176, %175 : vector<8x32xf32>
    %178 = arith.divf %176, %177 : vector<8x32xf32>
    %179 = arith.addf %168, %171 : vector<8x32xf32>
    %180 = arith.negf %179 : vector<8x32xf32>
    %181 = math.exp %180 : vector<8x32xf32>
    %cst_49 = arith.constant 1.000000e+00 : f32
    %182 = vector.broadcast %cst_49 : f32 to vector<8x32xf32>
    %183 = arith.addf %182, %181 : vector<8x32xf32>
    %184 = arith.divf %182, %183 : vector<8x32xf32>
    %185 = vector.broadcast %8 : vector<1x32xf32> to vector<8x32xf32>
    %186 = arith.addf %172, %185 : vector<8x32xf32>
    %187 = arith.mulf %178, %186 : vector<8x32xf32>
    %188 = arith.addf %169, %187 : vector<8x32xf32>
    %189 = math.tanh %188 : vector<8x32xf32>
    %cst_50 = arith.constant 1.000000e+00 : f32
    %190 = vector.broadcast %cst_50 : f32 to vector<8x32xf32>
    %191 = arith.subf %190, %184 : vector<8x32xf32>
    %192 = arith.mulf %191, %189 : vector<8x32xf32>
    %193 = arith.mulf %184, %163 : vector<8x32xf32>
    %194 = arith.addf %192, %193 : vector<8x32xf32>
    %c40_51 = arith.constant 40 : index
    %c0_52 = arith.constant 0 : index
    %195 = vector.load %arg5[%c40_51, %c0_52] : memref<64x32xf32, #tpu.memory_space<vmem>>, vector<8x32xf32>
    tpu.vector_store %arg5[%c40_51, %c0_52], %194 {strides = array<i32>} : memref<64x32xf32, #tpu.memory_space<vmem>>, vector<8x32xf32>,
    %cst_53 = arith.constant dense<0.000000e+00> : vector<8x96xf32>
    %196 = tpu.matmul %194, %7, %cst_53 {dimension_numbers = #tpu.dot_dimension_numbers<[1], [0], [0], [1], [0, 0, 1, 1], [], []>} : vector<8x32xf32>, vector<32x96xf32>, vector<8x96xf32> -> vector<8x96xf32>
    %c48 = arith.constant 48 : index
    %c0_54 = arith.constant 0 : index
    %197 = vector.load %arg4[%c48, %c0_54] : memref<64x96xf32, #tpu.memory_space<vmem>>, vector<8x96xf32>
    %198 = vector.extract_strided_slice %197 {offsets = [0, 0], sizes = [8, 32], strides = [1, 1]} : vector<8x96xf32> to vector<8x32xf32>
    %199 = vector.extract_strided_slice %197 {offsets = [0, 32], sizes = [8, 32], strides = [1, 1]} : vector<8x96xf32> to vector<8x32xf32>
    %200 = vector.extract_strided_slice %197 {offsets = [0, 64], sizes = [8, 32], strides = [1, 1]} : vector<8x96xf32> to vector<8x32xf32>
    %201 = vector.extract_strided_slice %196 {offsets = [0, 0], sizes = [8, 32], strides = [1, 1]} : vector<8x96xf32> to vector<8x32xf32>
    %202 = vector.extract_strided_slice %196 {offsets = [0, 32], sizes = [8, 32], strides = [1, 1]} : vector<8x96xf32> to vector<8x32xf32>
    %203 = vector.extract_strided_slice %196 {offsets = [0, 64], sizes = [8, 32], strides = [1, 1]} : vector<8x96xf32> to vector<8x32xf32>
    %204 = arith.addf %198, %201 : vector<8x32xf32>
    %205 = arith.negf %204 : vector<8x32xf32>
    %206 = math.exp %205 : vector<8x32xf32>
    %cst_55 = arith.constant 1.000000e+00 : f32
    %207 = vector.broadcast %cst_55 : f32 to vector<8x32xf32>
    %208 = arith.addf %207, %206 : vector<8x32xf32>
    %209 = arith.divf %207, %208 : vector<8x32xf32>
    %210 = arith.addf %199, %202 : vector<8x32xf32>
    %211 = arith.negf %210 : vector<8x32xf32>
    %212 = math.exp %211 : vector<8x32xf32>
    %cst_56 = arith.constant 1.000000e+00 : f32
    %213 = vector.broadcast %cst_56 : f32 to vector<8x32xf32>
    %214 = arith.addf %213, %212 : vector<8x32xf32>
    %215 = arith.divf %213, %214 : vector<8x32xf32>
    %216 = vector.broadcast %8 : vector<1x32xf32> to vector<8x32xf32>
    %217 = arith.addf %203, %216 : vector<8x32xf32>
    %218 = arith.mulf %209, %217 : vector<8x32xf32>
    %219 = arith.addf %200, %218 : vector<8x32xf32>
    %220 = math.tanh %219 : vector<8x32xf32>
    %cst_57 = arith.constant 1.000000e+00 : f32
    %221 = vector.broadcast %cst_57 : f32 to vector<8x32xf32>
    %222 = arith.subf %221, %215 : vector<8x32xf32>
    %223 = arith.mulf %222, %220 : vector<8x32xf32>
    %224 = arith.mulf %215, %194 : vector<8x32xf32>
    %225 = arith.addf %223, %224 : vector<8x32xf32>
    %c48_58 = arith.constant 48 : index
    %c0_59 = arith.constant 0 : index
    %226 = vector.load %arg5[%c48_58, %c0_59] : memref<64x32xf32, #tpu.memory_space<vmem>>, vector<8x32xf32>
    tpu.vector_store %arg5[%c48_58, %c0_59], %225 {strides = array<i32>} : memref<64x32xf32, #tpu.memory_space<vmem>>, vector<8x32xf32>,
    %cst_60 = arith.constant dense<0.000000e+00> : vector<8x96xf32>
    %227 = tpu.matmul %225, %7, %cst_60 {dimension_numbers = #tpu.dot_dimension_numbers<[1], [0], [0], [1], [0, 0, 1, 1], [], []>} : vector<8x32xf32>, vector<32x96xf32>, vector<8x96xf32> -> vector<8x96xf32>
    %c56 = arith.constant 56 : index
    %c0_61 = arith.constant 0 : index
    %228 = vector.load %arg4[%c56, %c0_61] : memref<64x96xf32, #tpu.memory_space<vmem>>, vector<8x96xf32>
    %229 = vector.extract_strided_slice %228 {offsets = [0, 0], sizes = [8, 32], strides = [1, 1]} : vector<8x96xf32> to vector<8x32xf32>
    %230 = vector.extract_strided_slice %228 {offsets = [0, 32], sizes = [8, 32], strides = [1, 1]} : vector<8x96xf32> to vector<8x32xf32>
    %231 = vector.extract_strided_slice %228 {offsets = [0, 64], sizes = [8, 32], strides = [1, 1]} : vector<8x96xf32> to vector<8x32xf32>
    %232 = vector.extract_strided_slice %227 {offsets = [0, 0], sizes = [8, 32], strides = [1, 1]} : vector<8x96xf32> to vector<8x32xf32>
    %233 = vector.extract_strided_slice %227 {offsets = [0, 32], sizes = [8, 32], strides = [1, 1]} : vector<8x96xf32> to vector<8x32xf32>
    %234 = vector.extract_strided_slice %227 {offsets = [0, 64], sizes = [8, 32], strides = [1, 1]} : vector<8x96xf32> to vector<8x32xf32>
    %235 = arith.addf %229, %232 : vector<8x32xf32>
    %236 = arith.negf %235 : vector<8x32xf32>
    %237 = math.exp %236 : vector<8x32xf32>
    %cst_62 = arith.constant 1.000000e+00 : f32
    %238 = vector.broadcast %cst_62 : f32 to vector<8x32xf32>
    %239 = arith.addf %238, %237 : vector<8x32xf32>
    %240 = arith.divf %238, %239 : vector<8x32xf32>
    %241 = arith.addf %230, %233 : vector<8x32xf32>
    %242 = arith.negf %241 : vector<8x32xf32>
    %243 = math.exp %242 : vector<8x32xf32>
    %cst_63 = arith.constant 1.000000e+00 : f32
    %244 = vector.broadcast %cst_63 : f32 to vector<8x32xf32>
    %245 = arith.addf %244, %243 : vector<8x32xf32>
    %246 = arith.divf %244, %245 : vector<8x32xf32>
    %247 = vector.broadcast %8 : vector<1x32xf32> to vector<8x32xf32>
    %248 = arith.addf %234, %247 : vector<8x32xf32>
    %249 = arith.mulf %240, %248 : vector<8x32xf32>
    %250 = arith.addf %231, %249 : vector<8x32xf32>
    %251 = math.tanh %250 : vector<8x32xf32>
    %cst_64 = arith.constant 1.000000e+00 : f32
    %252 = vector.broadcast %cst_64 : f32 to vector<8x32xf32>
    %253 = arith.subf %252, %246 : vector<8x32xf32>
    %254 = arith.mulf %253, %251 : vector<8x32xf32>
    %255 = arith.mulf %246, %225 : vector<8x32xf32>
    %256 = arith.addf %254, %255 : vector<8x32xf32>
    %c56_65 = arith.constant 56 : index
    %c0_66 = arith.constant 0 : index
    %257 = vector.load %arg5[%c56_65, %c0_66] : memref<64x32xf32, #tpu.memory_space<vmem>>, vector<8x32xf32>
    tpu.vector_store %arg5[%c56_65, %c0_66], %256 {strides = array<i32>} : memref<64x32xf32, #tpu.memory_space<vmem>>, vector<8x32xf32>,
    %c0_67 = arith.constant 0 : index
    %c0_68 = arith.constant 0 : index
    %258 = vector.load %arg5[%c0_67, %c0_68] : memref<64x32xf32, #tpu.memory_space<vmem>>, vector<64x32xf32>
    %c96 = arith.constant 96 : index
    %c0_69 = arith.constant 0 : index
    %259 = vector.load %arg1[%c96, %c0_69] : memref<224x96xf32, #tpu.memory_space<vmem>>, vector<32x96xf32>
    %cst_70 = arith.constant dense<0.000000e+00> : vector<64x96xf32>
    %260 = tpu.matmul %258, %259, %cst_70 {dimension_numbers = #tpu.dot_dimension_numbers<[1], [0], [0], [1], [0, 0, 1, 1], [], []>} : vector<64x32xf32>, vector<32x96xf32>, vector<64x96xf32> -> vector<64x96xf32>
    %c1 = arith.constant 1 : index
    %c0_71 = arith.constant 0 : index
    %261 = vector.load %arg2[%c1, %c0_71] : memref<8x96xf32, #tpu.memory_space<vmem>>, vector<1x96xf32>
    %262 = vector.broadcast %261 : vector<1x96xf32> to vector<64x96xf32>
    %263 = arith.addf %260, %262 : vector<64x96xf32>
    %c0_72 = arith.constant 0 : index
    %c0_73 = arith.constant 0 : index
    %264 = vector.load %arg4[%c0_72, %c0_73] : memref<64x96xf32, #tpu.memory_space<vmem>>, vector<64x96xf32>
    tpu.vector_store %arg4[%c0_72, %c0_73], %263 {strides = array<i32>} : memref<64x96xf32, #tpu.memory_space<vmem>>, vector<64x96xf32>,
    %c128 = arith.constant 128 : index
    %c0_74 = arith.constant 0 : index
    %265 = vector.load %arg1[%c128, %c0_74] : memref<224x96xf32, #tpu.memory_space<vmem>>, vector<32x96xf32>
    %c3 = arith.constant 3 : index
    %c0_75 = arith.constant 0 : index
    %266 = vector.load %arg2[%c3, %c0_75] : memref<8x96xf32, #tpu.memory_space<vmem>>, vector<1x32xf32>
    %cst_76 = arith.constant 0.000000e+00 : f32
    %267 = vector.broadcast %cst_76 : f32 to vector<8x32xf32>
    %cst_77 = arith.constant dense<0.000000e+00> : vector<8x96xf32>
    %268 = tpu.matmul %267, %265, %cst_77 {dimension_numbers = #tpu.dot_dimension_numbers<[1], [0], [0], [1], [0, 0, 1, 1], [], []>} : vector<8x32xf32>, vector<32x96xf32>, vector<8x96xf32> -> vector<8x96xf32>
    %c0_78 = arith.constant 0 : index
    %c0_79 = arith.constant 0 : index
    %269 = vector.load %arg4[%c0_78, %c0_79] : memref<64x96xf32, #tpu.memory_space<vmem>>, vector<8x96xf32>
    %270 = vector.extract_strided_slice %269 {offsets = [0, 0], sizes = [8, 32], strides = [1, 1]} : vector<8x96xf32> to vector<8x32xf32>
    %271 = vector.extract_strided_slice %269 {offsets = [0, 32], sizes = [8, 32], strides = [1, 1]} : vector<8x96xf32> to vector<8x32xf32>
    %272 = vector.extract_strided_slice %269 {offsets = [0, 64], sizes = [8, 32], strides = [1, 1]} : vector<8x96xf32> to vector<8x32xf32>
    %273 = vector.extract_strided_slice %268 {offsets = [0, 0], sizes = [8, 32], strides = [1, 1]} : vector<8x96xf32> to vector<8x32xf32>
    %274 = vector.extract_strided_slice %268 {offsets = [0, 32], sizes = [8, 32], strides = [1, 1]} : vector<8x96xf32> to vector<8x32xf32>
    %275 = vector.extract_strided_slice %268 {offsets = [0, 64], sizes = [8, 32], strides = [1, 1]} : vector<8x96xf32> to vector<8x32xf32>
    %276 = arith.addf %270, %273 : vector<8x32xf32>
    %277 = arith.negf %276 : vector<8x32xf32>
    %278 = math.exp %277 : vector<8x32xf32>
    %cst_80 = arith.constant 1.000000e+00 : f32
    %279 = vector.broadcast %cst_80 : f32 to vector<8x32xf32>
    %280 = arith.addf %279, %278 : vector<8x32xf32>
    %281 = arith.divf %279, %280 : vector<8x32xf32>
    %282 = arith.addf %271, %274 : vector<8x32xf32>
    %283 = arith.negf %282 : vector<8x32xf32>
    %284 = math.exp %283 : vector<8x32xf32>
    %cst_81 = arith.constant 1.000000e+00 : f32
    %285 = vector.broadcast %cst_81 : f32 to vector<8x32xf32>
    %286 = arith.addf %285, %284 : vector<8x32xf32>
    %287 = arith.divf %285, %286 : vector<8x32xf32>
    %288 = vector.broadcast %266 : vector<1x32xf32> to vector<8x32xf32>
    %289 = arith.addf %275, %288 : vector<8x32xf32>
    %290 = arith.mulf %281, %289 : vector<8x32xf32>
    %291 = arith.addf %272, %290 : vector<8x32xf32>
    %292 = math.tanh %291 : vector<8x32xf32>
    %cst_82 = arith.constant 1.000000e+00 : f32
    %293 = vector.broadcast %cst_82 : f32 to vector<8x32xf32>
    %294 = arith.subf %293, %287 : vector<8x32xf32>
    %295 = arith.mulf %294, %292 : vector<8x32xf32>
    %296 = arith.mulf %287, %267 : vector<8x32xf32>
    %297 = arith.addf %295, %296 : vector<8x32xf32>
    %cst_83 = arith.constant dense<0.000000e+00> : vector<8x96xf32>
    %298 = tpu.matmul %297, %265, %cst_83 {dimension_numbers = #tpu.dot_dimension_numbers<[1], [0], [0], [1], [0, 0, 1, 1], [], []>} : vector<8x32xf32>, vector<32x96xf32>, vector<8x96xf32> -> vector<8x96xf32>
    %c8_84 = arith.constant 8 : index
    %c0_85 = arith.constant 0 : index
    %299 = vector.load %arg4[%c8_84, %c0_85] : memref<64x96xf32, #tpu.memory_space<vmem>>, vector<8x96xf32>
    %300 = vector.extract_strided_slice %299 {offsets = [0, 0], sizes = [8, 32], strides = [1, 1]} : vector<8x96xf32> to vector<8x32xf32>
    %301 = vector.extract_strided_slice %299 {offsets = [0, 32], sizes = [8, 32], strides = [1, 1]} : vector<8x96xf32> to vector<8x32xf32>
    %302 = vector.extract_strided_slice %299 {offsets = [0, 64], sizes = [8, 32], strides = [1, 1]} : vector<8x96xf32> to vector<8x32xf32>
    %303 = vector.extract_strided_slice %298 {offsets = [0, 0], sizes = [8, 32], strides = [1, 1]} : vector<8x96xf32> to vector<8x32xf32>
    %304 = vector.extract_strided_slice %298 {offsets = [0, 32], sizes = [8, 32], strides = [1, 1]} : vector<8x96xf32> to vector<8x32xf32>
    %305 = vector.extract_strided_slice %298 {offsets = [0, 64], sizes = [8, 32], strides = [1, 1]} : vector<8x96xf32> to vector<8x32xf32>
    %306 = arith.addf %300, %303 : vector<8x32xf32>
    %307 = arith.negf %306 : vector<8x32xf32>
    %308 = math.exp %307 : vector<8x32xf32>
    %cst_86 = arith.constant 1.000000e+00 : f32
    %309 = vector.broadcast %cst_86 : f32 to vector<8x32xf32>
    %310 = arith.addf %309, %308 : vector<8x32xf32>
    %311 = arith.divf %309, %310 : vector<8x32xf32>
    %312 = arith.addf %301, %304 : vector<8x32xf32>
    %313 = arith.negf %312 : vector<8x32xf32>
    %314 = math.exp %313 : vector<8x32xf32>
    %cst_87 = arith.constant 1.000000e+00 : f32
    %315 = vector.broadcast %cst_87 : f32 to vector<8x32xf32>
    %316 = arith.addf %315, %314 : vector<8x32xf32>
    %317 = arith.divf %315, %316 : vector<8x32xf32>
    %318 = vector.broadcast %266 : vector<1x32xf32> to vector<8x32xf32>
    %319 = arith.addf %305, %318 : vector<8x32xf32>
    %320 = arith.mulf %311, %319 : vector<8x32xf32>
    %321 = arith.addf %302, %320 : vector<8x32xf32>
    %322 = math.tanh %321 : vector<8x32xf32>
    %cst_88 = arith.constant 1.000000e+00 : f32
    %323 = vector.broadcast %cst_88 : f32 to vector<8x32xf32>
    %324 = arith.subf %323, %317 : vector<8x32xf32>
    %325 = arith.mulf %324, %322 : vector<8x32xf32>
    %326 = arith.mulf %317, %297 : vector<8x32xf32>
    %327 = arith.addf %325, %326 : vector<8x32xf32>
    %cst_89 = arith.constant dense<0.000000e+00> : vector<8x96xf32>
    %328 = tpu.matmul %327, %265, %cst_89 {dimension_numbers = #tpu.dot_dimension_numbers<[1], [0], [0], [1], [0, 0, 1, 1], [], []>} : vector<8x32xf32>, vector<32x96xf32>, vector<8x96xf32> -> vector<8x96xf32>
    %c16_90 = arith.constant 16 : index
    %c0_91 = arith.constant 0 : index
    %329 = vector.load %arg4[%c16_90, %c0_91] : memref<64x96xf32, #tpu.memory_space<vmem>>, vector<8x96xf32>
    %330 = vector.extract_strided_slice %329 {offsets = [0, 0], sizes = [8, 32], strides = [1, 1]} : vector<8x96xf32> to vector<8x32xf32>
    %331 = vector.extract_strided_slice %329 {offsets = [0, 32], sizes = [8, 32], strides = [1, 1]} : vector<8x96xf32> to vector<8x32xf32>
    %332 = vector.extract_strided_slice %329 {offsets = [0, 64], sizes = [8, 32], strides = [1, 1]} : vector<8x96xf32> to vector<8x32xf32>
    %333 = vector.extract_strided_slice %328 {offsets = [0, 0], sizes = [8, 32], strides = [1, 1]} : vector<8x96xf32> to vector<8x32xf32>
    %334 = vector.extract_strided_slice %328 {offsets = [0, 32], sizes = [8, 32], strides = [1, 1]} : vector<8x96xf32> to vector<8x32xf32>
    %335 = vector.extract_strided_slice %328 {offsets = [0, 64], sizes = [8, 32], strides = [1, 1]} : vector<8x96xf32> to vector<8x32xf32>
    %336 = arith.addf %330, %333 : vector<8x32xf32>
    %337 = arith.negf %336 : vector<8x32xf32>
    %338 = math.exp %337 : vector<8x32xf32>
    %cst_92 = arith.constant 1.000000e+00 : f32
    %339 = vector.broadcast %cst_92 : f32 to vector<8x32xf32>
    %340 = arith.addf %339, %338 : vector<8x32xf32>
    %341 = arith.divf %339, %340 : vector<8x32xf32>
    %342 = arith.addf %331, %334 : vector<8x32xf32>
    %343 = arith.negf %342 : vector<8x32xf32>
    %344 = math.exp %343 : vector<8x32xf32>
    %cst_93 = arith.constant 1.000000e+00 : f32
    %345 = vector.broadcast %cst_93 : f32 to vector<8x32xf32>
    %346 = arith.addf %345, %344 : vector<8x32xf32>
    %347 = arith.divf %345, %346 : vector<8x32xf32>
    %348 = vector.broadcast %266 : vector<1x32xf32> to vector<8x32xf32>
    %349 = arith.addf %335, %348 : vector<8x32xf32>
    %350 = arith.mulf %341, %349 : vector<8x32xf32>
    %351 = arith.addf %332, %350 : vector<8x32xf32>
    %352 = math.tanh %351 : vector<8x32xf32>
    %cst_94 = arith.constant 1.000000e+00 : f32
    %353 = vector.broadcast %cst_94 : f32 to vector<8x32xf32>
    %354 = arith.subf %353, %347 : vector<8x32xf32>
    %355 = arith.mulf %354, %352 : vector<8x32xf32>
    %356 = arith.mulf %347, %327 : vector<8x32xf32>
    %357 = arith.addf %355, %356 : vector<8x32xf32>
    %cst_95 = arith.constant dense<0.000000e+00> : vector<8x96xf32>
    %358 = tpu.matmul %357, %265, %cst_95 {dimension_numbers = #tpu.dot_dimension_numbers<[1], [0], [0], [1], [0, 0, 1, 1], [], []>} : vector<8x32xf32>, vector<32x96xf32>, vector<8x96xf32> -> vector<8x96xf32>
    %c24_96 = arith.constant 24 : index
    %c0_97 = arith.constant 0 : index
    %359 = vector.load %arg4[%c24_96, %c0_97] : memref<64x96xf32, #tpu.memory_space<vmem>>, vector<8x96xf32>
    %360 = vector.extract_strided_slice %359 {offsets = [0, 0], sizes = [8, 32], strides = [1, 1]} : vector<8x96xf32> to vector<8x32xf32>
    %361 = vector.extract_strided_slice %359 {offsets = [0, 32], sizes = [8, 32], strides = [1, 1]} : vector<8x96xf32> to vector<8x32xf32>
    %362 = vector.extract_strided_slice %359 {offsets = [0, 64], sizes = [8, 32], strides = [1, 1]} : vector<8x96xf32> to vector<8x32xf32>
    %363 = vector.extract_strided_slice %358 {offsets = [0, 0], sizes = [8, 32], strides = [1, 1]} : vector<8x96xf32> to vector<8x32xf32>
    %364 = vector.extract_strided_slice %358 {offsets = [0, 32], sizes = [8, 32], strides = [1, 1]} : vector<8x96xf32> to vector<8x32xf32>
    %365 = vector.extract_strided_slice %358 {offsets = [0, 64], sizes = [8, 32], strides = [1, 1]} : vector<8x96xf32> to vector<8x32xf32>
    %366 = arith.addf %360, %363 : vector<8x32xf32>
    %367 = arith.negf %366 : vector<8x32xf32>
    %368 = math.exp %367 : vector<8x32xf32>
    %cst_98 = arith.constant 1.000000e+00 : f32
    %369 = vector.broadcast %cst_98 : f32 to vector<8x32xf32>
    %370 = arith.addf %369, %368 : vector<8x32xf32>
    %371 = arith.divf %369, %370 : vector<8x32xf32>
    %372 = arith.addf %361, %364 : vector<8x32xf32>
    %373 = arith.negf %372 : vector<8x32xf32>
    %374 = math.exp %373 : vector<8x32xf32>
    %cst_99 = arith.constant 1.000000e+00 : f32
    %375 = vector.broadcast %cst_99 : f32 to vector<8x32xf32>
    %376 = arith.addf %375, %374 : vector<8x32xf32>
    %377 = arith.divf %375, %376 : vector<8x32xf32>
    %378 = vector.broadcast %266 : vector<1x32xf32> to vector<8x32xf32>
    %379 = arith.addf %365, %378 : vector<8x32xf32>
    %380 = arith.mulf %371, %379 : vector<8x32xf32>
    %381 = arith.addf %362, %380 : vector<8x32xf32>
    %382 = math.tanh %381 : vector<8x32xf32>
    %cst_100 = arith.constant 1.000000e+00 : f32
    %383 = vector.broadcast %cst_100 : f32 to vector<8x32xf32>
    %384 = arith.subf %383, %377 : vector<8x32xf32>
    %385 = arith.mulf %384, %382 : vector<8x32xf32>
    %386 = arith.mulf %377, %357 : vector<8x32xf32>
    %387 = arith.addf %385, %386 : vector<8x32xf32>
    %cst_101 = arith.constant dense<0.000000e+00> : vector<8x96xf32>
    %388 = tpu.matmul %387, %265, %cst_101 {dimension_numbers = #tpu.dot_dimension_numbers<[1], [0], [0], [1], [0, 0, 1, 1], [], []>} : vector<8x32xf32>, vector<32x96xf32>, vector<8x96xf32> -> vector<8x96xf32>
    %c32_102 = arith.constant 32 : index
    %c0_103 = arith.constant 0 : index
    %389 = vector.load %arg4[%c32_102, %c0_103] : memref<64x96xf32, #tpu.memory_space<vmem>>, vector<8x96xf32>
    %390 = vector.extract_strided_slice %389 {offsets = [0, 0], sizes = [8, 32], strides = [1, 1]} : vector<8x96xf32> to vector<8x32xf32>
    %391 = vector.extract_strided_slice %389 {offsets = [0, 32], sizes = [8, 32], strides = [1, 1]} : vector<8x96xf32> to vector<8x32xf32>
    %392 = vector.extract_strided_slice %389 {offsets = [0, 64], sizes = [8, 32], strides = [1, 1]} : vector<8x96xf32> to vector<8x32xf32>
    %393 = vector.extract_strided_slice %388 {offsets = [0, 0], sizes = [8, 32], strides = [1, 1]} : vector<8x96xf32> to vector<8x32xf32>
    %394 = vector.extract_strided_slice %388 {offsets = [0, 32], sizes = [8, 32], strides = [1, 1]} : vector<8x96xf32> to vector<8x32xf32>
    %395 = vector.extract_strided_slice %388 {offsets = [0, 64], sizes = [8, 32], strides = [1, 1]} : vector<8x96xf32> to vector<8x32xf32>
    %396 = arith.addf %390, %393 : vector<8x32xf32>
    %397 = arith.negf %396 : vector<8x32xf32>
    %398 = math.exp %397 : vector<8x32xf32>
    %cst_104 = arith.constant 1.000000e+00 : f32
    %399 = vector.broadcast %cst_104 : f32 to vector<8x32xf32>
    %400 = arith.addf %399, %398 : vector<8x32xf32>
    %401 = arith.divf %399, %400 : vector<8x32xf32>
    %402 = arith.addf %391, %394 : vector<8x32xf32>
    %403 = arith.negf %402 : vector<8x32xf32>
    %404 = math.exp %403 : vector<8x32xf32>
    %cst_105 = arith.constant 1.000000e+00 : f32
    %405 = vector.broadcast %cst_105 : f32 to vector<8x32xf32>
    %406 = arith.addf %405, %404 : vector<8x32xf32>
    %407 = arith.divf %405, %406 : vector<8x32xf32>
    %408 = vector.broadcast %266 : vector<1x32xf32> to vector<8x32xf32>
    %409 = arith.addf %395, %408 : vector<8x32xf32>
    %410 = arith.mulf %401, %409 : vector<8x32xf32>
    %411 = arith.addf %392, %410 : vector<8x32xf32>
    %412 = math.tanh %411 : vector<8x32xf32>
    %cst_106 = arith.constant 1.000000e+00 : f32
    %413 = vector.broadcast %cst_106 : f32 to vector<8x32xf32>
    %414 = arith.subf %413, %407 : vector<8x32xf32>
    %415 = arith.mulf %414, %412 : vector<8x32xf32>
    %416 = arith.mulf %407, %387 : vector<8x32xf32>
    %417 = arith.addf %415, %416 : vector<8x32xf32>
    %cst_107 = arith.constant dense<0.000000e+00> : vector<8x96xf32>
    %418 = tpu.matmul %417, %265, %cst_107 {dimension_numbers = #tpu.dot_dimension_numbers<[1], [0], [0], [1], [0, 0, 1, 1], [], []>} : vector<8x32xf32>, vector<32x96xf32>, vector<8x96xf32> -> vector<8x96xf32>
    %c40_108 = arith.constant 40 : index
    %c0_109 = arith.constant 0 : index
    %419 = vector.load %arg4[%c40_108, %c0_109] : memref<64x96xf32, #tpu.memory_space<vmem>>, vector<8x96xf32>
    %420 = vector.extract_strided_slice %419 {offsets = [0, 0], sizes = [8, 32], strides = [1, 1]} : vector<8x96xf32> to vector<8x32xf32>
    %421 = vector.extract_strided_slice %419 {offsets = [0, 32], sizes = [8, 32], strides = [1, 1]} : vector<8x96xf32> to vector<8x32xf32>
    %422 = vector.extract_strided_slice %419 {offsets = [0, 64], sizes = [8, 32], strides = [1, 1]} : vector<8x96xf32> to vector<8x32xf32>
    %423 = vector.extract_strided_slice %418 {offsets = [0, 0], sizes = [8, 32], strides = [1, 1]} : vector<8x96xf32> to vector<8x32xf32>
    %424 = vector.extract_strided_slice %418 {offsets = [0, 32], sizes = [8, 32], strides = [1, 1]} : vector<8x96xf32> to vector<8x32xf32>
    %425 = vector.extract_strided_slice %418 {offsets = [0, 64], sizes = [8, 32], strides = [1, 1]} : vector<8x96xf32> to vector<8x32xf32>
    %426 = arith.addf %420, %423 : vector<8x32xf32>
    %427 = arith.negf %426 : vector<8x32xf32>
    %428 = math.exp %427 : vector<8x32xf32>
    %cst_110 = arith.constant 1.000000e+00 : f32
    %429 = vector.broadcast %cst_110 : f32 to vector<8x32xf32>
    %430 = arith.addf %429, %428 : vector<8x32xf32>
    %431 = arith.divf %429, %430 : vector<8x32xf32>
    %432 = arith.addf %421, %424 : vector<8x32xf32>
    %433 = arith.negf %432 : vector<8x32xf32>
    %434 = math.exp %433 : vector<8x32xf32>
    %cst_111 = arith.constant 1.000000e+00 : f32
    %435 = vector.broadcast %cst_111 : f32 to vector<8x32xf32>
    %436 = arith.addf %435, %434 : vector<8x32xf32>
    %437 = arith.divf %435, %436 : vector<8x32xf32>
    %438 = vector.broadcast %266 : vector<1x32xf32> to vector<8x32xf32>
    %439 = arith.addf %425, %438 : vector<8x32xf32>
    %440 = arith.mulf %431, %439 : vector<8x32xf32>
    %441 = arith.addf %422, %440 : vector<8x32xf32>
    %442 = math.tanh %441 : vector<8x32xf32>
    %cst_112 = arith.constant 1.000000e+00 : f32
    %443 = vector.broadcast %cst_112 : f32 to vector<8x32xf32>
    %444 = arith.subf %443, %437 : vector<8x32xf32>
    %445 = arith.mulf %444, %442 : vector<8x32xf32>
    %446 = arith.mulf %437, %417 : vector<8x32xf32>
    %447 = arith.addf %445, %446 : vector<8x32xf32>
    %cst_113 = arith.constant dense<0.000000e+00> : vector<8x96xf32>
    %448 = tpu.matmul %447, %265, %cst_113 {dimension_numbers = #tpu.dot_dimension_numbers<[1], [0], [0], [1], [0, 0, 1, 1], [], []>} : vector<8x32xf32>, vector<32x96xf32>, vector<8x96xf32> -> vector<8x96xf32>
    %c48_114 = arith.constant 48 : index
    %c0_115 = arith.constant 0 : index
    %449 = vector.load %arg4[%c48_114, %c0_115] : memref<64x96xf32, #tpu.memory_space<vmem>>, vector<8x96xf32>
    %450 = vector.extract_strided_slice %449 {offsets = [0, 0], sizes = [8, 32], strides = [1, 1]} : vector<8x96xf32> to vector<8x32xf32>
    %451 = vector.extract_strided_slice %449 {offsets = [0, 32], sizes = [8, 32], strides = [1, 1]} : vector<8x96xf32> to vector<8x32xf32>
    %452 = vector.extract_strided_slice %449 {offsets = [0, 64], sizes = [8, 32], strides = [1, 1]} : vector<8x96xf32> to vector<8x32xf32>
    %453 = vector.extract_strided_slice %448 {offsets = [0, 0], sizes = [8, 32], strides = [1, 1]} : vector<8x96xf32> to vector<8x32xf32>
    %454 = vector.extract_strided_slice %448 {offsets = [0, 32], sizes = [8, 32], strides = [1, 1]} : vector<8x96xf32> to vector<8x32xf32>
    %455 = vector.extract_strided_slice %448 {offsets = [0, 64], sizes = [8, 32], strides = [1, 1]} : vector<8x96xf32> to vector<8x32xf32>
    %456 = arith.addf %450, %453 : vector<8x32xf32>
    %457 = arith.negf %456 : vector<8x32xf32>
    %458 = math.exp %457 : vector<8x32xf32>
    %cst_116 = arith.constant 1.000000e+00 : f32
    %459 = vector.broadcast %cst_116 : f32 to vector<8x32xf32>
    %460 = arith.addf %459, %458 : vector<8x32xf32>
    %461 = arith.divf %459, %460 : vector<8x32xf32>
    %462 = arith.addf %451, %454 : vector<8x32xf32>
    %463 = arith.negf %462 : vector<8x32xf32>
    %464 = math.exp %463 : vector<8x32xf32>
    %cst_117 = arith.constant 1.000000e+00 : f32
    %465 = vector.broadcast %cst_117 : f32 to vector<8x32xf32>
    %466 = arith.addf %465, %464 : vector<8x32xf32>
    %467 = arith.divf %465, %466 : vector<8x32xf32>
    %468 = vector.broadcast %266 : vector<1x32xf32> to vector<8x32xf32>
    %469 = arith.addf %455, %468 : vector<8x32xf32>
    %470 = arith.mulf %461, %469 : vector<8x32xf32>
    %471 = arith.addf %452, %470 : vector<8x32xf32>
    %472 = math.tanh %471 : vector<8x32xf32>
    %cst_118 = arith.constant 1.000000e+00 : f32
    %473 = vector.broadcast %cst_118 : f32 to vector<8x32xf32>
    %474 = arith.subf %473, %467 : vector<8x32xf32>
    %475 = arith.mulf %474, %472 : vector<8x32xf32>
    %476 = arith.mulf %467, %447 : vector<8x32xf32>
    %477 = arith.addf %475, %476 : vector<8x32xf32>
    %cst_119 = arith.constant dense<0.000000e+00> : vector<8x96xf32>
    %478 = tpu.matmul %477, %265, %cst_119 {dimension_numbers = #tpu.dot_dimension_numbers<[1], [0], [0], [1], [0, 0, 1, 1], [], []>} : vector<8x32xf32>, vector<32x96xf32>, vector<8x96xf32> -> vector<8x96xf32>
    %c56_120 = arith.constant 56 : index
    %c0_121 = arith.constant 0 : index
    %479 = vector.load %arg4[%c56_120, %c0_121] : memref<64x96xf32, #tpu.memory_space<vmem>>, vector<8x96xf32>
    %480 = vector.extract_strided_slice %479 {offsets = [0, 0], sizes = [8, 32], strides = [1, 1]} : vector<8x96xf32> to vector<8x32xf32>
    %481 = vector.extract_strided_slice %479 {offsets = [0, 32], sizes = [8, 32], strides = [1, 1]} : vector<8x96xf32> to vector<8x32xf32>
    %482 = vector.extract_strided_slice %479 {offsets = [0, 64], sizes = [8, 32], strides = [1, 1]} : vector<8x96xf32> to vector<8x32xf32>
    %483 = vector.extract_strided_slice %478 {offsets = [0, 0], sizes = [8, 32], strides = [1, 1]} : vector<8x96xf32> to vector<8x32xf32>
    %484 = vector.extract_strided_slice %478 {offsets = [0, 32], sizes = [8, 32], strides = [1, 1]} : vector<8x96xf32> to vector<8x32xf32>
    %485 = vector.extract_strided_slice %478 {offsets = [0, 64], sizes = [8, 32], strides = [1, 1]} : vector<8x96xf32> to vector<8x32xf32>
    %486 = arith.addf %480, %483 : vector<8x32xf32>
    %487 = arith.negf %486 : vector<8x32xf32>
    %488 = math.exp %487 : vector<8x32xf32>
    %cst_122 = arith.constant 1.000000e+00 : f32
    %489 = vector.broadcast %cst_122 : f32 to vector<8x32xf32>
    %490 = arith.addf %489, %488 : vector<8x32xf32>
    %491 = arith.divf %489, %490 : vector<8x32xf32>
    %492 = arith.addf %481, %484 : vector<8x32xf32>
    %493 = arith.negf %492 : vector<8x32xf32>
    %494 = math.exp %493 : vector<8x32xf32>
    %cst_123 = arith.constant 1.000000e+00 : f32
    %495 = vector.broadcast %cst_123 : f32 to vector<8x32xf32>
    %496 = arith.addf %495, %494 : vector<8x32xf32>
    %497 = arith.divf %495, %496 : vector<8x32xf32>
    %498 = vector.broadcast %266 : vector<1x32xf32> to vector<8x32xf32>
    %499 = arith.addf %485, %498 : vector<8x32xf32>
    %500 = arith.mulf %491, %499 : vector<8x32xf32>
    %501 = arith.addf %482, %500 : vector<8x32xf32>
    %502 = math.tanh %501 : vector<8x32xf32>
    %cst_124 = arith.constant 1.000000e+00 : f32
    %503 = vector.broadcast %cst_124 : f32 to vector<8x32xf32>
    %504 = arith.subf %503, %497 : vector<8x32xf32>
    %505 = arith.mulf %504, %502 : vector<8x32xf32>
    %506 = arith.mulf %497, %477 : vector<8x32xf32>
    %507 = arith.addf %505, %506 : vector<8x32xf32>
    %c160 = arith.constant 160 : index
    %c0_125 = arith.constant 0 : index
    %508 = vector.load %arg1[%c160, %c0_125] : memref<224x96xf32, #tpu.memory_space<vmem>>, vector<32x32xf32>
    %cst_126 = arith.constant dense<0.000000e+00> : vector<8x32xf32>
    %509 = tpu.matmul %507, %508, %cst_126 {dimension_numbers = #tpu.dot_dimension_numbers<[1], [0], [0], [1], [0, 0, 1, 1], [], []>} : vector<8x32xf32>, vector<32x32xf32>, vector<8x32xf32> -> vector<8x32xf32>
    %c4 = arith.constant 4 : index
    %c0_127 = arith.constant 0 : index
    %510 = vector.load %arg2[%c4, %c0_127] : memref<8x96xf32, #tpu.memory_space<vmem>>, vector<1x32xf32>
    %511 = vector.broadcast %510 : vector<1x32xf32> to vector<8x32xf32>
    %512 = arith.addf %509, %511 : vector<8x32xf32>
    %cst_128 = arith.constant 0.000000e+00 : f32
    %513 = vector.broadcast %cst_128 : f32 to vector<8x32xf32>
    %514 = arith.maximumf %512, %513 : vector<8x32xf32>
    %c192 = arith.constant 192 : index
    %c0_129 = arith.constant 0 : index
    %515 = vector.load %arg1[%c192, %c0_129] : memref<224x96xf32, #tpu.memory_space<vmem>>, vector<32x1xf32>
    %cst_130 = arith.constant dense<0.000000e+00> : vector<8x1xf32>
    %516 = tpu.matmul %514, %515, %cst_130 {dimension_numbers = #tpu.dot_dimension_numbers<[1], [0], [0], [1], [0, 0, 1, 1], [], []>} : vector<8x32xf32>, vector<32x1xf32>, vector<8x1xf32> -> vector<8x1xf32>
    %c5 = arith.constant 5 : index
    %c0_131 = arith.constant 0 : index
    %517 = vector.load %arg2[%c5, %c0_131] : memref<8x96xf32, #tpu.memory_space<vmem>>, vector<1x1xf32>
    %518 = vector.broadcast %517 : vector<1x1xf32> to vector<8x1xf32>
    %519 = arith.addf %516, %518 : vector<8x1xf32>
    %520 = vector.extract_strided_slice %519 {offsets = [0, 0], sizes = [2, 1], strides = [1, 1]} : vector<8x1xf32> to vector<2x1xf32>
    %c0_132 = arith.constant 0 : index
    %c0_133 = arith.constant 0 : index
    %521 = vector.load %arg3[%c0_132, %c0_133] : memref<2x1xf32, #tpu.memory_space<vmem>>, vector<2x1xf32>
    tpu.vector_store %arg3[%c0_132, %c0_133], %520 {strides = array<i32>} : memref<2x1xf32, #tpu.memory_space<vmem>>, vector<2x1xf32>,
    return
  }
}

</mosaic_0001>

<bundles_post_ra>
// kernel: tpu_custom_call.1
= control target key start
LH: loop header
LB: loop body
LE: loop exit
PB: predicated region body
PF: predicated region fallthrough
CT: control target
= control target key end

     0   :  { %v2706_v0 = vmov 0.0   ;;  %vm2707_vm0 = vmmov 0   ;;  %vm35_vm1 = vcmask 523264   ;;  %s2708_s11 = smov 64   ;;  %vm165_vm2 = vcmask 785408   ;;  %s2709_s18 = smov 96   ;;  %s3219_s1 = inlined_call_operand.vmem [shape: f32[224,96], index: 1, kind: input, shape index: {}]   ;;  %s3220_s0 = inlined_call_operand.vmem [shape: f32[64,64], index: 0, kind: input, shape index: {}]   ;;  %s3221_s2 = inlined_call_operand.vmem [shape: f32[8,96], index: 2, kind: input, shape index: {}]   ;;  %s3222_s3 = inlined_call_operand.vmem [shape: f32[2,1], index: 3, kind: output, shape index: {}]  }
   0x1   :  { %2388 = vmatprep.subr.mxu1 %v2706_v0  ;;  %v29_v1 = vld [vmem:[%s3219_s1 + $0x38] sm:$0xff]  ;;  %v28_v3 = vld [vmem:[%s3219_s1 + $0x30] sm:$0xff]  ;;  %2396 = vmatprep.mubr.msk.f32.mxu1 %vm2707_vm0, %v2706_v0  ;;  %v27_v5 = vld [vmem:[%s3219_s1 + $0x28] sm:$0xff]  ;;  %vm179_vm3 = vcmask 261120   ;;  %vm2182_vm4 = vcmask 1024  }
   0x2   :  { %v2737_v2 = vld [vmem:[%s3219_s1 + $0x58] sm:$0xff]  ;;  %2360 = vmatprep.subr.mxu0 %v29_v1  ;;  %v2748_v4 = vld [vmem:[%s3219_s1 + $0x50] sm:$0xff]  ;;  %v2757_v6 = vld [vmem:[%s3219_s1 + $0x48] sm:$0xff] }
   0x3   :  { %2389 = vmatpush3.msra.mxu1 %v2737_v2  ;;  %2361 = vmatpush3.msra.mxu0 %v29_v1  ;;  %v26_v7 = vld [vmem:[%s3219_s1 + $0x20] sm:$0xff]  ;;  %v25_v9 = vld [vmem:[%s3219_s1 + $0x18] sm:$0xff]  ;;  %v24_v12 = vld [vmem:[%s3219_s1 + $0x10] sm:$0xff] }
   0x4   :  { %2390 = vmatprep.subr.mxu1 %v2706_v0  ;;  %2362 = vmatprep.subr.mxu0 %v28_v3  ;;  %v2767_v8 = vld [vmem:[%s3219_s1 + $0x40] sm:$0xff]  ;;  %v23_v13 = vld [vmem:[%s3219_s1 + $0x8] sm:$0xff]  ;;  %v16_v55 = vld [vmem:[%s3220_s0 + $0x10] sm:$0xff] }
   0x5   :  { %2391 = vmatpush3.msra.mxu1 %v2748_v4  ;;  %2363 = vmatpush3.msra.mxu0 %v28_v3  ;;  %v14_v10 = vld [vmem:[%s3220_s0] sm:$0xff]  ;;  %v15_v15 = vld [vmem:[%s3220_s0 + $0x8] sm:$0xff]  ;;  %v17_v56 = vld [vmem:[%s3220_s0 + $0x18] sm:$0xff] }
   0x6   :  { %2392 = vmatprep.subr.mxu1 %v2706_v0  ;;  %2364 = vmatprep.subr.mxu0 %v27_v5  ;;  %v2198_v11 = vld [vmem:[%s3221_s2 + $0x2] ss:$0 sm:$0xff]  ;;  %v2824_v21 = vld [vmem:[%s3221_s2] ss:$0 sm:$0xff] }
   0x7   :  { %2393 = vmatpush3.msra.mxu1 %v2757_v6  ;;  %2365 = vmatpush3.msra.mxu0 %v27_v5  ;;  %v22_v14 = vld [vmem:[%s3219_s1] sm:$0xff] }
   0x8   :  { %2394 = vmatprep.subr.mxu1 %v2706_v0  ;;  %2366 = vmatprep.subr.mxu0 %v26_v7 }
   0x9   :  { %2395 = vmatpush3.msra.mxu1 %v2767_v8  ;;  %2367 = vmatpush3.msra.mxu0 %v26_v7 }
   0xa   :  { %2397 = vmatmul.mubr.f32.vlgmr.msra.gmra.mxu1 %v2706_v0  ;;  %2368 = vmatprep.subr.mxu0 %v25_v9 }
   0xb   :  { %2376 = vmatprep.mubr.msk.f32.mxu0 %vm35_vm1, %v14_v10  ;;  %2369 = vmatpush3.msra.mxu0 %v25_v9 }
   0xc   :  { %266 = vrot.lane.b32.xlu0 %v2198_v11, %s2708_s11  ;;  %2370 = vmatprep.subr.mxu0 %v24_v12 }
   0xd   :  { %2399 = vmatprep.subr.mxu1 %v2706_v0  ;;  %2371 = vmatpush3.msra.mxu0 %v24_v12 }
   0xe   :  { %2400 = vmatpush3.msra.mxu1 %v2737_v2  ;;  %2372 = vmatprep.subr.mxu0 %v23_v13 }
   0xf   :  { %2401 = vmatprep.subr.mxu1 %v2706_v0  ;;  %2373 = vmatpush3.msra.mxu0 %v23_v13 }
  0x10   :  { %2402 = vmatpush3.msra.mxu1 %v2748_v4  ;;  %2374 = vmatprep.subr.mxu0 %v22_v14 }
  0x11   :  { %2403 = vmatprep.subr.mxu1 %v2706_v0  ;;  %2375 = vmatpush3.msra.mxu0 %v22_v14 }
  0x12   :  { %2404 = vmatpush3.msra.mxu1 %v2757_v6  ;;  %2377 = vmatmul.mubr.msk.f32.vlgmr.msra.gmra.mxu0 %vm35_vm1, %v15_v15 }
  0x13   :  { %2405 = vmatprep.subr.mxu1 %v2706_v0  ;;  %2407 = vmatprep.mubr.msk.f32.mxu1 %vm2707_vm0, %v2706_v0 }
  0x14   :  { %2406 = vmatpush3.msra.mxu1 %v2767_v8  ;;  %2421 = vmatprep.subr.mxu0 %v2706_v0 }
  0x15   :  { %2410 = vmatprep.subr.mxu1 %v2706_v0  ;;  %2422 = vmatpush3.msra.mxu0 %v2737_v2 }
  0x16   :  { %2423 = vmatprep.subr.mxu0 %v2706_v0  ;;  %2379 = vmatprep.mubr.msk.f32.mxu0 %vm35_vm1, %v16_v55 }
  0x17   :  { %2424 = vmatpush3.msra.mxu0 %v2748_v4 }
  0x18   :  { %2425 = vmatprep.subr.mxu0 %v2706_v0  ;;  %2380 = vmatmul.mubr.msk.f32.gmra.mxu0 %vm35_vm1, %v17_v56 }
  0x19   :  { %2426 = vmatpush3.msra.mxu0 %v2757_v6 }
  0x1a   :  { %2427 = vmatprep.subr.mxu0 %v2706_v0 }
  0x1b   :  { %2428 = vmatpush3.msra.mxu0 %v2767_v8 }
  0x1c   :  { %2443 = vmatprep.subr.mxu0 %v2706_v0 }
  0x7e   :  { %v2817_v16 = vpop.permute.xlu0 %266 }
  0xca   :  { %v249_v17 = vpop.f32.mrf.mxu1 }
  0xcb   :  { %v269_v18 = vadd.f32 %v2817_v16, %v249_v17 }
  0xcc   :  { %v2398_v19 = vpop.f32.mrf.mxu1 }
  0xcd   :  { %271 = vrot.lane.b32.xlu0 %v269_v18, %s2708_s11 }
  0xd2   :  { %v2378_v20 = vpop.f32.mrf.mxu0 }
  0xd3   :  { %v132_v22 = vadd.f32 %v2378_v20, %v2824_v21 }
  0xd4   :  { %v126_v23 = vpop.f32.mrf.mxu0 }
  0xd5   :  { %167 = vst.msk [vmem:[#allocation2 + $0x8] sm:$0xff] %vm165_vm2, %v132_v22  ;;  %v127_v24 = vadd.f32 %v2824_v21, %v126_v23 }
  0xd7   :  { %166 = vst.msk [vmem:[#allocation2] sm:$0xff] %vm165_vm2, %v127_v24  ;;  %v18_v24 = vld [vmem:[%s3220_s0 + $0x20] sm:$0xff] }
  0xd8   :  { %v2381_v63 = vpop.f32.mrf.mxu0  ;;  %2382 = vmatprep.mubr.msk.f32.mxu0 %vm35_vm1, %v18_v24 }
  0xd9   :  { %v142_v1 = vadd.f32 %v2381_v63, %v2824_v21 }
  0xda   :  { %v136_v3 = vpop.f32.mrf.mxu0 }
  0xdb   :  { %169 = vst.msk [vmem:[#allocation2 + $0x18] sm:$0xff] %vm165_vm2, %v142_v1  ;;  %v137_v5 = vadd.f32 %v2824_v21, %v136_v3 }
  0xdc   :  { %v366_v45 = vld [vmem:[#allocation2 + $0x8] sm:$0xff] }
  0xdd   :  { %168 = vst.msk [vmem:[#allocation2 + $0x10] sm:$0xff] %vm165_vm2, %v137_v5 }
  0xde   :  { %v253_v25 = vld [vmem:[#allocation2] sm:$0xff] }
  0xdf   :  { %v254_v26 = vadd.f32 %v253_v25, %v249_v17 }
  0xe1   :  { %v2197_v27 = vmul.f32 -1.442695, %v254_v26  ;;  %v20_v26 = vld [vmem:[%s3220_s0 + $0x30] sm:$0xff] }
  0xe3   :  { %2610 = vpow2.f32 %v2197_v27  ;;  %v21_v27 = vld [vmem:[%s3220_s0 + $0x38] sm:$0xff] }
  0xe4   :  { %v471_v12 = vld [vmem:[#allocation2 + $0x10] sm:$0xff] }
  0xf0   :  { %v2611_v28 = vpop.eup %2610 }
  0xf1   :  { %v258_v29 = vadd.f32 1.0, %v2611_v28 }
  0xf3   :  { %2612 = vrcp.f32 %v258_v29 }
 0x100   :  { %v2613_v30 = vpop.eup %2612 }
 0x101   :  { %v281_v36 = vsub.f32 1.0, %v2613_v30  ;;  %v287_v38 = vmul.f32 0.0, %v2613_v30 }
 0x13f   :  { %v272_v31 = vpop.permute.xlu0 %271 }
 0x140   :  { %v274_v32 = vmul.f32 %v2613_v30, %v272_v31 }
 0x142   :  { %276 = vrot.lane.b32.xlu1 %v274_v32, %s2708_s11 }
 0x1b4   :  { %v277_v33 = vpop.permute.xlu1 %276 }
 0x1b5   :  { %v279_v34 = vadd.f32 %v277_v33, %v253_v25  ;;  %v19_v25 = vld [vmem:[%s3220_s0 + $0x28] sm:$0xff] }
 0x1b6   :  { %2383 = vmatmul.mubr.msk.f32.gmra.mxu0 %vm35_vm1, %v19_v25 }
 0x1b7   :  { %2614 = vtanh.f32 %v279_v34  ;;  %2385 = vmatprep.mubr.msk.f32.mxu0 %vm35_vm1, %v20_v26 }
 0x1ba   :  { %2386 = vmatmul.mubr.msk.f32.gmra.mxu0 %vm35_vm1, %v21_v27 }
 0x1bb   :  { %2429 = vmatprep.mubr.msk.f32.mxu0 %vm2707_vm0, %v2706_v0 }
 0x1c4   :  { %v2615_v35 = vpop.eup %2614 }
 0x1c5   :  { %283 = vrot.lane.b32.xlu1 %v2615_v35, %s2709_s18 }
 0x237   :  { %v284_v37 = vpop.permute.xlu1 %283 }
 0x238   :  { %v286_v39 = vmul.f32 %v284_v37, %v281_v36 }
 0x23a   :  { %v288_v40 = vadd.f32 %v287_v38, %v286_v39 }
 0x23c   :  { %290 = vrot.lane.b32.xlu0 %v288_v40, %s2709_s18 }
 0x276   :  { %v2384_v34 = vpop.f32.mrf.mxu0 }
 0x277   :  { %v152_v35 = vadd.f32 %v2384_v34, %v2824_v21  ;;  %v1040_v34 = vld [vmem:[%s3219_s1 + $0x78] sm:$0xff] }
 0x278   :  { %v146_v36 = vpop.f32.mrf.mxu0 }
 0x279   :  { %171 = vst.msk [vmem:[#allocation2 + $0x28] sm:$0xff] %vm165_vm2, %v152_v35  ;;  %v147_v37 = vadd.f32 %v2824_v21, %v146_v36 }
 0x27a   :  { %v2387_v38 = vpop.f32.mrf.mxu0 }
 0x27b   :  { %170 = vst.msk [vmem:[#allocation2 + $0x20] sm:$0xff] %vm165_vm2, %v147_v37  ;;  %v162_v39 = vadd.f32 %v2387_v38, %v2824_v21 }
 0x27d   :  { %173 = vst.msk [vmem:[#allocation2 + $0x38] sm:$0xff] %vm165_vm2, %v162_v39 }
 0x280   :  { %v786_v27 = vld [vmem:[#allocation2 + $0x28] sm:$0xff] }
 0x282   :  { %v681_v3 = vld [vmem:[#allocation2 + $0x20] sm:$0xff] }
 0x2ae   :  { %v291_v41 = vpop.permute.xlu0 %290 }
 0x2af   :  { %293 = vst.msk [vmem:[#allocation3] sm:$0xff] %vm179_vm3, %v291_v41  ;;  %2408 = vmatmul.mubr.msk.f32.vlgmr.msra.gmra.mxu1 %vm179_vm3, %v291_v41 }
 0x2b0   :  { %2411 = vmatpush3.msra.mxu1 %v2737_v2  ;;  %2418 = vmatprep.mubr.msk.f32.mxu1 %vm2707_vm0, %v2706_v0 }
 0x2b1   :  { %2412 = vmatprep.subr.mxu1 %v2706_v0 }
 0x2b2   :  { %2413 = vmatpush3.msra.mxu1 %v2748_v4 }
 0x2b3   :  { %2414 = vmatprep.subr.mxu1 %v2706_v0 }
 0x2b4   :  { %2415 = vmatpush3.msra.mxu1 %v2757_v6 }
 0x2b5   :  { %2416 = vmatprep.subr.mxu1 %v2706_v0 }
 0x2b6   :  { %2417 = vmatpush3.msra.mxu1 %v2767_v8 }
 0x2b7   :  { %2432 = vmatprep.subr.mxu1 %v2706_v0 }
 0x36f   :  { %v362_v42 = vpop.f32.mrf.mxu1 }
 0x370   :  { %v374_v43 = vadd.f32 %v362_v42, %v2817_v16  ;;  %v367_v46 = vadd.f32 %v366_v45, %v362_v42 }
 0x371   :  { %v2409_v44 = vpop.f32.mrf.mxu1 }
 0x372   :  { %376 = vrot.lane.b32.xlu1 %v374_v43, %s2708_s11  ;;  %v2200_v47 = vmul.f32 -1.442695, %v367_v46 }
 0x374   :  { %2616 = vpow2.f32 %v2200_v47 }
 0x381   :  { %v2617_v48 = vpop.eup %2616 }
 0x382   :  { %v371_v49 = vadd.f32 1.0, %v2617_v48 }
 0x384   :  { %2618 = vrcp.f32 %v371_v49 }
 0x391   :  { %v2619_v50 = vpop.eup %2618 }
 0x392   :  { %v386_v58 = vsub.f32 1.0, %v2619_v50  ;;  %v392_v60 = vmul.f32 %v2619_v50, %v288_v40  ;;  %v156_v40 = vpop.f32.mrf.mxu0 }
 0x393   :  { %v157_v41 = vadd.f32 %v2824_v21, %v156_v40 }
 0x395   :  { %172 = vst.msk [vmem:[#allocation2 + $0x30] sm:$0xff] %vm165_vm2, %v157_v41 }
 0x3e4   :  { %v377_v51 = vpop.permute.xlu1 %376 }
 0x3e5   :  { %v379_v52 = vmul.f32 %v2619_v50, %v377_v51 }
 0x3e7   :  { %381 = vrot.lane.b32.xlu0 %v379_v52, %s2708_s11 }
 0x459   :  { %v382_v53 = vpop.permute.xlu0 %381 }
 0x45a   :  { %v384_v54 = vadd.f32 %v382_v53, %v366_v45  ;;  %v576_v45 = vld [vmem:[#allocation2 + $0x18] sm:$0xff] }
 0x45c   :  { %2620 = vtanh.f32 %v384_v54 }
 0x469   :  { %v2621_v57 = vpop.eup %2620 }
 0x46a   :  { %388 = vrot.lane.b32.xlu1 %v2621_v57, %s2709_s18 }
 0x4dc   :  { %v389_v59 = vpop.permute.xlu1 %388 }
 0x4dd   :  { %v391_v61 = vmul.f32 %v389_v59, %v386_v58 }
 0x4df   :  { %v393_v62 = vadd.f32 %v392_v60, %v391_v61 }
 0x4e1   :  { %395 = vrot.lane.b32.xlu0 %v393_v62, %s2709_s18 }
 0x553   :  { %v396_v7 = vpop.permute.xlu0 %395 }
 0x554   :  { %398 = vst.msk [vmem:[#allocation3 + $0x8] sm:$0xff] %vm179_vm3, %v396_v7  ;;  %2419 = vmatmul.mubr.msk.f32.vlgmr.msra.gmra.mxu1 %vm179_vm3, %v396_v7 }
 0x555   :  { %2433 = vmatpush3.msra.mxu1 %v2737_v2  ;;  %2440 = vmatprep.mubr.msk.f32.mxu1 %vm2707_vm0, %v2706_v0 }
 0x556   :  { %2434 = vmatprep.subr.mxu1 %v2706_v0 }
 0x557   :  { %2435 = vmatpush3.msra.mxu1 %v2748_v4 }
 0x558   :  { %2436 = vmatprep.subr.mxu1 %v2706_v0 }
 0x559   :  { %2437 = vmatpush3.msra.mxu1 %v2757_v6 }
 0x55a   :  { %2438 = vmatprep.subr.mxu1 %v2706_v0 }
 0x55b   :  { %2439 = vmatpush3.msra.mxu1 %v2767_v8 }
 0x55c   :  { %2454 = vmatprep.subr.mxu1 %v2706_v0 }
 0x614   :  { %v467_v9 = vpop.f32.mrf.mxu1 }
 0x615   :  { %v479_v10 = vadd.f32 %v467_v9, %v2817_v16  ;;  %v472_v13 = vadd.f32 %v471_v12, %v467_v9 }
 0x616   :  { %v2420_v11 = vpop.f32.mrf.mxu1 }
 0x617   :  { %481 = vrot.lane.b32.xlu1 %v479_v10, %s2708_s11  ;;  %v2202_v14 = vmul.f32 -1.442695, %v472_v13 }
 0x619   :  { %2622 = vpow2.f32 %v2202_v14 }
 0x626   :  { %v2623_v15 = vpop.eup %2622 }
 0x627   :  { %v476_v17 = vadd.f32 1.0, %v2623_v15 }
 0x629   :  { %2624 = vrcp.f32 %v476_v17 }
 0x636   :  { %v2625_v18 = vpop.eup %2624 }
 0x637   :  { %v491_v29 = vsub.f32 1.0, %v2625_v18  ;;  %v497_v31 = vmul.f32 %v2625_v18, %v393_v62 }
 0x689   :  { %v482_v19 = vpop.permute.xlu1 %481 }
 0x68a   :  { %v484_v20 = vmul.f32 %v2625_v18, %v482_v19 }
 0x68c   :  { %486 = vrot.lane.b32.xlu0 %v484_v20, %s2708_s11 }
 0x6fe   :  { %v487_v22 = vpop.permute.xlu0 %486 }
 0x6ff   :  { %v489_v23 = vadd.f32 %v487_v22, %v471_v12 }
 0x701   :  { %2626 = vtanh.f32 %v489_v23 }
 0x70e   :  { %v2627_v28 = vpop.eup %2626 }
 0x70f   :  { %493 = vrot.lane.b32.xlu1 %v2627_v28, %s2709_s18 }
 0x781   :  { %v494_v30 = vpop.permute.xlu1 %493 }
 0x782   :  { %v496_v32 = vmul.f32 %v494_v30, %v491_v29 }
 0x784   :  { %v498_v33 = vadd.f32 %v497_v31, %v496_v32 }
 0x786   :  { %500 = vrot.lane.b32.xlu0 %v498_v33, %s2709_s18 }
 0x7f8   :  { %v501_v42 = vpop.permute.xlu0 %500 }
 0x7f9   :  { %503 = vst.msk [vmem:[#allocation3 + $0x10] sm:$0xff] %vm179_vm3, %v501_v42  ;;  %2430 = vmatmul.mubr.msk.f32.vlgmr.msra.gmra.mxu0 %vm179_vm3, %v501_v42  ;;  %v1039_v42 = vld [vmem:[%s3219_s1 + $0x70] sm:$0xff] }
 0x7fa   :  { %2444 = vmatpush3.msra.mxu0 %v2737_v2  ;;  %2451 = vmatprep.mubr.msk.f32.mxu0 %vm2707_vm0, %v2706_v0 }
 0x7fb   :  { %2445 = vmatprep.subr.mxu0 %v2706_v0 }
 0x7fc   :  { %2446 = vmatpush3.msra.mxu0 %v2748_v4 }
 0x7fd   :  { %2447 = vmatprep.subr.mxu0 %v2706_v0 }
 0x7fe   :  { %2448 = vmatpush3.msra.mxu0 %v2757_v6 }
 0x7ff   :  { %2449 = vmatprep.subr.mxu0 %v2706_v0 }
 0x800   :  { %2450 = vmatpush3.msra.mxu0 %v2767_v8 }
 0x801   :  { %2465 = vmatprep.subr.mxu0 %v2706_v0 }
 0x8b9   :  { %v572_v21 = vpop.f32.mrf.mxu0 }
 0x8ba   :  { %v584_v43 = vadd.f32 %v572_v21, %v2817_v16  ;;  %v577_v46 = vadd.f32 %v576_v45, %v572_v21  ;;  %v1029_v21 = vld [vmem:[#allocation3] sm:$0xff] }
 0x8bb   :  { %v2431_v44 = vpop.f32.mrf.mxu0 }
 0x8bc   :  { %586 = vrot.lane.b32.xlu1 %v584_v43, %s2708_s11  ;;  %v2204_v47 = vmul.f32 -1.442695, %v577_v46  ;;  %v1038_v43 = vld [vmem:[%s3219_s1 + $0x68] sm:$0xff]  ;;  %v1037_v44 = vld [vmem:[%s3219_s1 + $0x60] sm:$0xff]  ;;  %v1031_v46 = vld [vmem:[#allocation3 + $0x10] sm:$0xff] }
 0x8be   :  { %2628 = vpow2.f32 %v2204_v47 }
 0x8cb   :  { %v2629_v48 = vpop.eup %2628 }
 0x8cc   :  { %v581_v49 = vadd.f32 1.0, %v2629_v48 }
 0x8ce   :  { %2630 = vrcp.f32 %v581_v49 }
 0x8db   :  { %v2631_v50 = vpop.eup %2630 }
 0x8dc   :  { %v596_v56 = vsub.f32 1.0, %v2631_v50  ;;  %v602_v58 = vmul.f32 %v2631_v50, %v498_v33 }
 0x92e   :  { %v587_v51 = vpop.permute.xlu1 %586 }
 0x92f   :  { %v589_v52 = vmul.f32 %v2631_v50, %v587_v51 }
 0x931   :  { %591 = vrot.lane.b32.xlu0 %v589_v52, %s2708_s11 }
 0x9a3   :  { %v592_v53 = vpop.permute.xlu0 %591 }
 0x9a4   :  { %v594_v54 = vadd.f32 %v592_v53, %v576_v45  ;;  %v1030_v45 = vld [vmem:[#allocation3 + $0x8] sm:$0xff]  ;;  %v2984_v53 = vld [vmem:[%s3221_s2 + $0x1] ss:$0 sm:$0xff] }
 0x9a6   :  { %2632 = vtanh.f32 %v594_v54 }
 0x9b3   :  { %v2633_v55 = vpop.eup %2632 }
 0x9b4   :  { %598 = vrot.lane.b32.xlu1 %v2633_v55, %s2709_s18 }
 0xa26   :  { %v599_v57 = vpop.permute.xlu1 %598 }
 0xa27   :  { %v601_v59 = vmul.f32 %v599_v57, %v596_v56 }
 0xa29   :  { %v603_v60 = vadd.f32 %v602_v58, %v601_v59 }
 0xa2b   :  { %605 = vrot.lane.b32.xlu0 %v603_v60, %s2709_s18 }
 0xa9d   :  { %v606_v61 = vpop.permute.xlu0 %605 }
 0xa9e   :  { %608 = vst.msk [vmem:[#allocation3 + $0x18] sm:$0xff] %vm179_vm3, %v606_v61  ;;  %2441 = vmatmul.mubr.msk.f32.vlgmr.msra.gmra.mxu1 %vm179_vm3, %v606_v61 }
 0xa9f   :  { %2455 = vmatpush3.msra.mxu1 %v2737_v2  ;;  %2462 = vmatprep.mubr.msk.f32.mxu1 %vm2707_vm0, %v2706_v0 }
 0xaa0   :  { %2456 = vmatprep.subr.mxu1 %v2706_v0 }
 0xaa1   :  { %2457 = vmatpush3.msra.mxu1 %v2748_v4 }
 0xaa2   :  { %2458 = vmatprep.subr.mxu1 %v2706_v0 }
 0xaa3   :  { %2459 = vmatpush3.msra.mxu1 %v2757_v6 }
 0xaa4   :  { %2460 = vmatprep.subr.mxu1 %v2706_v0 }
 0xaa5   :  { %2461 = vmatpush3.msra.mxu1 %v2767_v8  ;;  %v1032_v47 = vld [vmem:[#allocation3 + $0x18] sm:$0xff] }
 0xaa6   :  { %2476 = vmatprep.subr.mxu1 %v1040_v34 }
 0xb5e   :  { %v677_v62 = vpop.f32.mrf.mxu1 }
 0xb5f   :  { %v689_v63 = vadd.f32 %v677_v62, %v2817_v16  ;;  %v682_v5 = vadd.f32 %v681_v3, %v677_v62 }
 0xb60   :  { %v2442_v1 = vpop.f32.mrf.mxu1 }
 0xb61   :  { %691 = vrot.lane.b32.xlu1 %v689_v63, %s2708_s11  ;;  %v2206_v7 = vmul.f32 -1.442695, %v682_v5  ;;  %v891_v5 = vld [vmem:[#allocation2 + $0x30] sm:$0xff] }
 0xb63   :  { %2634 = vpow2.f32 %v2206_v7 }
 0xb70   :  { %v2635_v9 = vpop.eup %2634 }
 0xb71   :  { %v686_v10 = vadd.f32 1.0, %v2635_v9 }
 0xb73   :  { %2636 = vrcp.f32 %v686_v10 }
 0xb80   :  { %v2637_v11 = vpop.eup %2636 }
 0xb81   :  { %v701_v18 = vsub.f32 1.0, %v2637_v11  ;;  %v707_v20 = vmul.f32 %v2637_v11, %v603_v60 }
 0xbd3   :  { %v692_v12 = vpop.permute.xlu1 %691 }
 0xbd4   :  { %v694_v13 = vmul.f32 %v2637_v11, %v692_v12 }
 0xbd6   :  { %696 = vrot.lane.b32.xlu0 %v694_v13, %s2708_s11 }
 0xc48   :  { %v697_v14 = vpop.permute.xlu0 %696 }
 0xc49   :  { %v699_v15 = vadd.f32 %v697_v14, %v681_v3 }
 0xc4b   :  { %2638 = vtanh.f32 %v699_v15 }
 0xc58   :  { %v2639_v17 = vpop.eup %2638 }
 0xc59   :  { %703 = vrot.lane.b32.xlu1 %v2639_v17, %s2709_s18 }
 0xccb   :  { %v704_v19 = vpop.permute.xlu1 %703 }
 0xccc   :  { %v706_v22 = vmul.f32 %v704_v19, %v701_v18  ;;  %v3003_v19 = vld [vmem:[%s3219_s1 + $0x98] sm:$0xff] }
 0xcce   :  { %v708_v23 = vadd.f32 %v707_v20, %v706_v22  ;;  %v3009_v20 = vld [vmem:[%s3219_s1 + $0x90] sm:$0xff]  ;;  %v3016_v22 = vld [vmem:[%s3219_s1 + $0x88] sm:$0xff] }
 0xcd0   :  { %710 = vrot.lane.b32.xlu0 %v708_v23, %s2709_s18 }
 0xd42   :  { %v711_v24 = vpop.permute.xlu0 %710 }
 0xd43   :  { %713 = vst.msk [vmem:[#allocation3 + $0x20] sm:$0xff] %vm179_vm3, %v711_v24  ;;  %2452 = vmatmul.mubr.msk.f32.vlgmr.msra.gmra.mxu0 %vm179_vm3, %v711_v24 }
 0xd44   :  { %2466 = vmatpush3.msra.mxu0 %v2737_v2  ;;  %2473 = vmatprep.mubr.msk.f32.mxu0 %vm2707_vm0, %v2706_v0 }
 0xd45   :  { %2467 = vmatprep.subr.mxu0 %v2706_v0 }
 0xd46   :  { %2468 = vmatpush3.msra.mxu0 %v2748_v4 }
 0xd47   :  { %2469 = vmatprep.subr.mxu0 %v2706_v0 }
 0xd48   :  { %2470 = vmatpush3.msra.mxu0 %v2757_v6 }
 0xd49   :  { %2471 = vmatprep.subr.mxu0 %v2706_v0 }
 0xd4a   :  { %2472 = vmatpush3.msra.mxu0 %v2767_v8  ;;  %v1033_v48 = vld [vmem:[#allocation3 + $0x20] sm:$0xff] }
 0xd4b   :  { %2496 = vmatprep.subr.mxu0 %v2706_v0 }
 0xe03   :  { %v782_v25 = vpop.f32.mrf.mxu0 }
 0xe04   :  { %v794_v2 = vadd.f32 %v782_v25, %v2817_v16  ;;  %v787_v28 = vadd.f32 %v786_v27, %v782_v25 }
 0xe05   :  { %v2453_v26 = vpop.f32.mrf.mxu0 }
 0xe06   :  { %796 = vrot.lane.b32.xlu1 %v794_v2, %s2708_s11  ;;  %v2208_v29 = vmul.f32 -1.442695, %v787_v28  ;;  %v2223_v2 = vld [vmem:[%s3221_s2 + $0x3] ss:$0 sm:$0xff] }
 0xe08   :  { %2640 = vpow2.f32 %v2208_v29 }
 0xe15   :  { %v2641_v4 = vpop.eup %2640 }
 0xe16   :  { %v791_v30 = vadd.f32 1.0, %v2641_v4 }
 0xe18   :  { %2642 = vrcp.f32 %v791_v30 }
 0xe25   :  { %v2643_v6 = vpop.eup %2642 }
 0xe26   :  { %v806_v36 = vsub.f32 1.0, %v2643_v6  ;;  %v812_v38 = vmul.f32 %v2643_v6, %v708_v23  ;;  %v3023_v23 = vld [vmem:[%s3219_s1 + $0x80] sm:$0xff] }
 0xe78   :  { %v797_v31 = vpop.permute.xlu1 %796 }
 0xe79   :  { %v799_v32 = vmul.f32 %v2643_v6, %v797_v31 }
 0xe7b   :  { %801 = vrot.lane.b32.xlu0 %v799_v32, %s2708_s11 }
 0xeed   :  { %v802_v8 = vpop.permute.xlu0 %801 }
 0xeee   :  { %v804_v33 = vadd.f32 %v802_v8, %v786_v27 }
 0xef0   :  { %2644 = vtanh.f32 %v804_v33 }
 0xefd   :  { %v2645_v35 = vpop.eup %2644 }
 0xefe   :  { %808 = vrot.lane.b32.xlu1 %v2645_v35, %s2709_s18 }
 0xf70   :  { %v809_v37 = vpop.permute.xlu1 %808 }
 0xf71   :  { %v811_v39 = vmul.f32 %v809_v37, %v806_v36 }
 0xf73   :  { %v2957_v40 = vadd.f32 %v812_v38, %v811_v39 }
 0xf75   :  { %815 = vrot.lane.b32.xlu0 %v2957_v40, %s2709_s18 }
 0xfe7   :  { %v816_v41 = vpop.permute.xlu0 %815 }
 0xfe8   :  { %818 = vst.msk [vmem:[#allocation3 + $0x28] sm:$0xff] %vm179_vm3, %v816_v41  ;;  %2463 = vmatmul.mubr.msk.f32.vlgmr.msra.gmra.mxu1 %vm179_vm3, %v816_v41 }
 0xfe9   :  { %2477 = vmatpush3.msra.mxu1 %v1040_v34  ;;  %2484 = vmatprep.mubr.msk.f32.mxu1 %vm179_vm3, %v1029_v21 }
 0xfea   :  { %2478 = vmatprep.subr.mxu1 %v1039_v42 }
 0xfeb   :  { %2479 = vmatpush3.msra.mxu1 %v1039_v42 }
 0xfec   :  { %2480 = vmatprep.subr.mxu1 %v1038_v43 }
 0xfed   :  { %2481 = vmatpush3.msra.mxu1 %v1038_v43 }
 0xfee   :  { %2482 = vmatprep.subr.mxu1 %v1037_v44 }
 0xfef   :  { %2483 = vmatpush3.msra.mxu1 %v1037_v44  ;;  %v1034_v49 = vld [vmem:[#allocation3 + $0x28] sm:$0xff] }
 0xff0   :  { %2485 = vmatmul.mubr.msk.f32.vlgmr.msra.gmra.mxu1 %vm179_vm3, %v1030_v45  ;;  %2518 = vmatprep.subr.mxu1 %v2706_v0  ;;  %v996_v45 = vld [vmem:[#allocation2 + $0x38] sm:$0xff] }
 0xff1   :  { %2487 = vmatprep.mubr.msk.f32.mxu1 %vm179_vm3, %v1031_v46  ;;  %2519 = vmatpush3.msra.mxu1 %v3003_v19 }
 0xff2   :  { %2520 = vmatprep.subr.mxu1 %v2706_v0 }
 0xff3   :  { %2521 = vmatpush3.msra.mxu1 %v3009_v20 }
 0xff4   :  { %2488 = vmatmul.mubr.msk.f32.gmra.mxu1 %vm179_vm3, %v1032_v47  ;;  %2522 = vmatprep.subr.mxu1 %v2706_v0 }
 0xff5   :  { %2490 = vmatprep.mubr.msk.f32.mxu1 %vm179_vm3, %v1033_v48  ;;  %2523 = vmatpush3.msra.mxu1 %v3016_v22 }
 0xff6   :  { %2524 = vmatprep.subr.mxu1 %v2706_v0 }
 0xff7   :  { %2525 = vmatpush3.msra.mxu1 %v3023_v23 }
 0xff8   :  { %2491 = vmatmul.mubr.msk.f32.gmra.mxu1 %vm179_vm3, %v1034_v49  ;;  %2540 = vmatprep.subr.mxu1 %v2706_v0 }
0x10a8   :  { %v887_v50 = vpop.f32.mrf.mxu1 }
0x10a9   :  { %v899_v51 = vadd.f32 %v887_v50, %v2817_v16  ;;  %v892_v7 = vadd.f32 %v891_v5, %v887_v50 }
0x10aa   :  { %v2464_v52 = vpop.f32.mrf.mxu1 }
0x10ab   :  { %901 = vrot.lane.b32.xlu1 %v899_v51, %s2708_s11  ;;  %v2210_v9 = vmul.f32 -1.442695, %v892_v7 }
0x10ad   :  { %2646 = vpow2.f32 %v2210_v9 }
0x10b0   :  { %v2486_v54 = vpop.f32.mrf.mxu1 }
0x10b1   :  { %v1142_v55 = vadd.f32 %v2486_v54, %v2984_v53 }
0x10b2   :  { %v1136_v56 = vpop.f32.mrf.mxu1 }
0x10b3   :  { %1176 = vst.msk [vmem:[#allocation2 + $0x8] sm:$0xff] %vm165_vm2, %v1142_v55  ;;  %v1137_v57 = vadd.f32 %v2984_v53, %v1136_v56 }
0x10b4   :  { %v2489_v58 = vpop.f32.mrf.mxu1 }
0x10b5   :  { %1175 = vst.msk [vmem:[#allocation2] sm:$0xff] %vm165_vm2, %v1137_v57  ;;  %v1152_v59 = vadd.f32 %v2489_v58, %v2984_v53 }
0x10b6   :  { %v1146_v60 = vpop.f32.mrf.mxu1 }
0x10b7   :  { %1178 = vst.msk [vmem:[#allocation2 + $0x18] sm:$0xff] %vm165_vm2, %v1152_v59  ;;  %v1147_v61 = vadd.f32 %v2984_v53, %v1146_v60 }
0x10b8   :  { %v2492_v62 = vpop.f32.mrf.mxu1 }
0x10b9   :  { %1177 = vst.msk [vmem:[#allocation2 + $0x10] sm:$0xff] %vm165_vm2, %v1147_v61  ;;  %v1162_v63 = vadd.f32 %v2492_v62, %v2984_v53 }
0x10ba   :  { %v1156_v1 = vpop.f32.mrf.mxu1  ;;  %v2647_v10 = vpop.eup %2646 }
0x10bb   :  { %1180 = vst.msk [vmem:[#allocation2 + $0x28] sm:$0xff] %vm165_vm2, %v1162_v63  ;;  %v1157_v3 = vadd.f32 %v2984_v53, %v1156_v1  ;;  %v896_v11 = vadd.f32 1.0, %v2647_v10 }
0x10bc   :  { %v1258_v34 = vld [vmem:[#allocation2] sm:$0xff] }
0x10bd   :  { %1179 = vst.msk [vmem:[#allocation2 + $0x20] sm:$0xff] %vm165_vm2, %v1157_v3  ;;  %2648 = vrcp.f32 %v896_v11 }
0x10ca   :  { %v2649_v12 = vpop.eup %2648 }
0x10cb   :  { %v911_v24 = vsub.f32 1.0, %v2649_v12  ;;  %v917_v26 = vmul.f32 %v2649_v12, %v2957_v40 }
0x111d   :  { %v902_v13 = vpop.permute.xlu1 %901 }
0x111e   :  { %v904_v14 = vmul.f32 %v2649_v12, %v902_v13  ;;  %v1369_v13 = vld [vmem:[#allocation2 + $0x8] sm:$0xff] }
0x1120   :  { %906 = vrot.lane.b32.xlu0 %v904_v14, %s2708_s11 }
0x1192   :  { %v907_v15 = vpop.permute.xlu0 %906 }
0x1193   :  { %v909_v17 = vadd.f32 %v907_v15, %v891_v5 }
0x1195   :  { %2650 = vtanh.f32 %v909_v17 }
0x11a2   :  { %v2651_v18 = vpop.eup %2650 }
0x11a3   :  { %913 = vrot.lane.b32.xlu1 %v2651_v18, %s2709_s18 }
0x11a7   :  { %1271 = vrot.lane.b32.xlu1 %v2223_v2, %s2708_s11 }
0x1215   :  { %v914_v25 = vpop.permute.xlu1 %913 }
0x1216   :  { %v916_v27 = vmul.f32 %v914_v25, %v911_v24 }
0x1218   :  { %v3033_v28 = vadd.f32 %v917_v26, %v916_v27 }
0x1219   :  { %v3061_v31 = vpop.permute.xlu1 %1271 }
0x121a   :  { %920 = vrot.lane.b32.xlu0 %v3033_v28, %s2709_s18 }
0x128c   :  { %v921_v29 = vpop.permute.xlu0 %920 }
0x128d   :  { %923 = vst.msk [vmem:[#allocation3 + $0x30] sm:$0xff] %vm179_vm3, %v921_v29  ;;  %2474 = vmatmul.mubr.msk.f32.vlgmr.msra.gmra.mxu0 %vm179_vm3, %v921_v29 }
0x128e   :  { %2497 = vmatpush3.msra.mxu0 %v3003_v19  ;;  %2504 = vmatprep.mubr.msk.f32.mxu0 %vm2707_vm0, %v2706_v0 }
0x128f   :  { %2498 = vmatprep.subr.mxu0 %v2706_v0 }
0x1290   :  { %2499 = vmatpush3.msra.mxu0 %v3009_v20 }
0x1291   :  { %2500 = vmatprep.subr.mxu0 %v2706_v0 }
0x1292   :  { %2501 = vmatpush3.msra.mxu0 %v3016_v22 }
0x1293   :  { %2502 = vmatprep.subr.mxu0 %v2706_v0 }
0x1294   :  { %2503 = vmatpush3.msra.mxu0 %v3023_v23  ;;  %v1035_v4 = vld [vmem:[#allocation3 + $0x30] sm:$0xff] }
0x1295   :  { %2505 = vmatmul.mubr.f32.vlgmr.msra.gmra.mxu0 %v2706_v0  ;;  %2493 = vmatprep.mubr.msk.f32.mxu1 %vm179_vm3, %v1035_v4 }
0x1296   :  { %2507 = vmatprep.subr.mxu0 %v2706_v0  ;;  %2515 = vmatprep.mubr.msk.f32.mxu0 %vm2707_vm0, %v2706_v0 }
0x1297   :  { %2508 = vmatpush3.msra.mxu0 %v3003_v19 }
0x1298   :  { %2509 = vmatprep.subr.mxu0 %v2706_v0 }
0x1299   :  { %2510 = vmatpush3.msra.mxu0 %v3009_v20 }
0x129a   :  { %2511 = vmatprep.subr.mxu0 %v2706_v0 }
0x129b   :  { %2512 = vmatpush3.msra.mxu0 %v3016_v22 }
0x129c   :  { %2513 = vmatprep.subr.mxu0 %v2706_v0 }
0x129d   :  { %2514 = vmatpush3.msra.mxu0 %v3023_v23 }
0x129e   :  { %2529 = vmatprep.subr.mxu0 %v2706_v0 }
0x134d   :  { %v992_v30 = vpop.f32.mrf.mxu0 }
0x134e   :  { %v1004_v44 = vadd.f32 %v992_v30, %v2817_v16  ;;  %v997_v46 = vadd.f32 %v996_v45, %v992_v30 }
0x134f   :  { %v2475_v6 = vpop.f32.mrf.mxu0 }
0x1350   :  { %v2212_v47 = vmul.f32 -1.442695, %v997_v46 }
0x1355   :  { %v1254_v32 = vpop.f32.mrf.mxu0 }
0x1356   :  { %v1274_v8 = vadd.f32 %v3061_v31, %v1254_v32  ;;  %v1259_v35 = vadd.f32 %v1258_v34, %v1254_v32 }
0x1357   :  { %v2506_v33 = vpop.f32.mrf.mxu0 }
0x1358   :  { %1276 = vrot.lane.b32.xlu0 %v1274_v8, %s2708_s11  ;;  %v2222_v36 = vmul.f32 -1.442695, %v1259_v35 }
0x135a   :  { %2652 = vpow2.f32 %v2222_v36 }
0x1367   :  { %v2653_v37 = vpop.eup %2652 }
0x1368   :  { %v1263_v38 = vadd.f32 1.0, %v2653_v37 }
0x136a   :  { %2654 = vrcp.f32 %v1263_v38 }
0x1377   :  { %v2655_v39 = vpop.eup %2654 }
0x1378   :  { %v1286_v50 = vsub.f32 1.0, %v2655_v39  ;;  %v1292_v52 = vmul.f32 0.0, %v2655_v39 }
0x13ca   :  { %v1277_v40 = vpop.permute.xlu0 %1276 }
0x13cb   :  { %v1279_v41 = vmul.f32 %v2655_v39, %v1277_v40  ;;  %v1472_v39 = vld [vmem:[#allocation2 + $0x10] sm:$0xff] }
0x13cd   :  { %1281 = vrot.lane.b32.xlu1 %v1279_v41, %s2708_s11 }
0x143f   :  { %v1282_v42 = vpop.permute.xlu1 %1281 }
0x1440   :  { %v1284_v21 = vadd.f32 %v1282_v42, %v1258_v34 }
0x1442   :  { %2656 = vtanh.f32 %v1284_v21 }
0x1443   :  { %2658 = vpow2.f32 %v2212_v47 }
0x144f   :  { %v2657_v43 = vpop.eup %2656 }
0x1450   :  { %1288 = vrot.lane.b32.xlu0 %v2657_v43, %s2709_s18  ;;  %v2659_v48 = vpop.eup %2658 }
0x1451   :  { %v1001_v49 = vadd.f32 1.0, %v2659_v48 }
0x1453   :  { %2660 = vrcp.f32 %v1001_v49 }
0x1454   :  { %1006 = vrot.lane.b32.xlu0 %v1004_v44, %s2708_s11 }
0x1460   :  { %v2661_v56 = vpop.eup %2660 }
0x1461   :  { %v1016_v62 = vsub.f32 1.0, %v2661_v56  ;;  %v1022_v1 = vmul.f32 %v2661_v56, %v3033_v28 }
0x14c2   :  { %v1289_v51 = vpop.permute.xlu0 %1288 }
0x14c3   :  { %v1291_v54 = vmul.f32 %v1289_v51, %v1286_v50 }
0x14c5   :  { %v1293_v55 = vadd.f32 %v1292_v52, %v1291_v54 }
0x14c6   :  { %v1007_v57 = vpop.permute.xlu0 %1006 }
0x14c7   :  { %v1009_v58 = vmul.f32 %v2661_v56, %v1007_v57  ;;  %1295 = vrot.lane.b32.xlu1 %v1293_v55, %s2709_s18 }
0x14c9   :  { %1011 = vrot.lane.b32.xlu0 %v1009_v58, %s2708_s11 }
0x1539   :  { %v1296_v16 = vpop.permute.xlu1 %1295 }
0x153a   :  { %2516 = vmatmul.mubr.msk.f32.vlgmr.msra.gmra.mxu0 %vm179_vm3, %v1296_v16  ;;  %v1575_v16 = vld [vmem:[#allocation2 + $0x18] sm:$0xff] }
0x153b   :  { %v1012_v59 = vpop.permute.xlu0 %1011  ;;  %2530 = vmatpush3.msra.mxu0 %v3003_v19  ;;  %2537 = vmatprep.mubr.msk.f32.mxu0 %vm2707_vm0, %v2706_v0 }
0x153c   :  { %v1014_v60 = vadd.f32 %v1012_v59, %v996_v45  ;;  %2531 = vmatprep.subr.mxu0 %v2706_v0 }
0x153d   :  { %2532 = vmatpush3.msra.mxu0 %v3009_v20 }
0x153e   :  { %2662 = vtanh.f32 %v1014_v60  ;;  %2533 = vmatprep.subr.mxu0 %v2706_v0 }
0x153f   :  { %2534 = vmatpush3.msra.mxu0 %v3016_v22 }
0x1540   :  { %2535 = vmatprep.subr.mxu0 %v2706_v0 }
0x1541   :  { %2536 = vmatpush3.msra.mxu0 %v3023_v23 }
0x1542   :  { %2551 = vmatprep.subr.mxu0 %v2706_v0 }
0x154b   :  { %v2663_v61 = vpop.eup %2662 }
0x154c   :  { %1018 = vrot.lane.b32.xlu0 %v2663_v61, %s2709_s18 }
0x15be   :  { %v1019_v63 = vpop.permute.xlu0 %1018 }
0x15bf   :  { %v1021_v3 = vmul.f32 %v1019_v63, %v1016_v62 }
0x15c1   :  { %v1023_v5 = vadd.f32 %v1022_v1, %v1021_v3 }
0x15c3   :  { %1025 = vrot.lane.b32.xlu0 %v1023_v5, %s2709_s18 }
0x15fa   :  { %v1365_v7 = vpop.f32.mrf.mxu0 }
0x15fb   :  { %v1377_v9 = vadd.f32 %v1365_v7, %v3061_v31  ;;  %v1370_v14 = vadd.f32 %v1369_v13, %v1365_v7 }
0x15fc   :  { %v2517_v10 = vpop.f32.mrf.mxu0 }
0x15fd   :  { %1379 = vrot.lane.b32.xlu1 %v1377_v9, %s2708_s11  ;;  %v2225_v15 = vmul.f32 -1.442695, %v1370_v14 }
0x15ff   :  { %2664 = vpow2.f32 %v2225_v15 }
0x160c   :  { %v2665_v17 = vpop.eup %2664 }
0x160d   :  { %v1374_v18 = vadd.f32 1.0, %v2665_v17 }
0x160f   :  { %2666 = vrcp.f32 %v1374_v18 }
0x161c   :  { %v2667_v24 = vpop.eup %2666 }
0x161d   :  { %v1389_v32 = vsub.f32 1.0, %v2667_v24  ;;  %v1395_v33 = vmul.f32 %v2667_v24, %v1293_v55 }
0x1635   :  { %v1026_v11 = vpop.permute.xlu0 %1025 }
0x1636   :  { %1028 = vst.msk [vmem:[#allocation3 + $0x38] sm:$0xff] %vm179_vm3, %v1026_v11 }
0x163d   :  { %v1036_v12 = vld [vmem:[#allocation3 + $0x38] sm:$0xff] }
0x163e   :  { %2494 = vmatmul.mubr.msk.f32.gmra.mxu1 %vm179_vm3, %v1036_v12 }
0x163f   :  { %2526 = vmatprep.mubr.msk.f32.mxu1 %vm2707_vm0, %v2706_v0 }
0x166f   :  { %v1380_v25 = vpop.permute.xlu1 %1379 }
0x1670   :  { %v1382_v2 = vmul.f32 %v2667_v24, %v1380_v25  ;;  %v1678_v25 = vld [vmem:[#allocation2 + $0x20] sm:$0xff] }
0x1672   :  { %1384 = vrot.lane.b32.xlu1 %v1382_v2, %s2708_s11 }
0x16e4   :  { %v1385_v26 = vpop.permute.xlu1 %1384 }
0x16e5   :  { %v1387_v27 = vadd.f32 %v1385_v26, %v1369_v13 }
0x16e7   :  { %2668 = vtanh.f32 %v1387_v27 }
0x16f4   :  { %v2669_v28 = vpop.eup %2668 }
0x16f5   :  { %1391 = vrot.lane.b32.xlu1 %v2669_v28, %s2709_s18 }
0x16fe   :  { %v2495_v29 = vpop.f32.mrf.mxu1 }
0x16ff   :  { %v1172_v4 = vadd.f32 %v2495_v29, %v2984_v53 }
0x1700   :  { %v1166_v30 = vpop.f32.mrf.mxu1 }
0x1701   :  { %1182 = vst.msk [vmem:[#allocation2 + $0x38] sm:$0xff] %vm165_vm2, %v1172_v4  ;;  %v1167_v6 = vadd.f32 %v2984_v53, %v1166_v30 }
0x1703   :  { %1181 = vst.msk [vmem:[#allocation2 + $0x30] sm:$0xff] %vm165_vm2, %v1167_v6 }
0x1767   :  { %v1392_v8 = vpop.permute.xlu1 %1391 }
0x1768   :  { %v1394_v34 = vmul.f32 %v1392_v8, %v1389_v32 }
0x176a   :  { %v1396_v35 = vadd.f32 %v1395_v33, %v1394_v34 }
0x176c   :  { %1398 = vrot.lane.b32.xlu1 %v1396_v35, %s2709_s18 }
0x17de   :  { %v1399_v36 = vpop.permute.xlu1 %1398 }
0x17df   :  { %2527 = vmatmul.mubr.msk.f32.vlgmr.msra.gmra.mxu1 %vm179_vm3, %v1399_v36 }
0x17e0   :  { %2541 = vmatpush3.msra.mxu1 %v3003_v19  ;;  %2548 = vmatprep.mubr.msk.f32.mxu1 %vm2707_vm0, %v2706_v0 }
0x17e1   :  { %2542 = vmatprep.subr.mxu1 %v2706_v0 }
0x17e2   :  { %2543 = vmatpush3.msra.mxu1 %v3009_v20 }
0x17e3   :  { %2544 = vmatprep.subr.mxu1 %v2706_v0 }
0x17e4   :  { %2545 = vmatpush3.msra.mxu1 %v3016_v22 }
0x17e5   :  { %2546 = vmatprep.subr.mxu1 %v2706_v0 }
0x17e6   :  { %2547 = vmatpush3.msra.mxu1 %v3023_v23 }
0x17e7   :  { %2562 = vmatprep.subr.mxu1 %v2706_v0 }
0x189f   :  { %v1468_v53 = vpop.f32.mrf.mxu1 }
0x18a0   :  { %v1480_v37 = vadd.f32 %v1468_v53, %v3061_v31  ;;  %v1473_v40 = vadd.f32 %v1472_v39, %v1468_v53 }
0x18a1   :  { %v2528_v38 = vpop.f32.mrf.mxu1 }
0x18a2   :  { %1482 = vrot.lane.b32.xlu0 %v1480_v37, %s2708_s11  ;;  %v2227_v41 = vmul.f32 -1.442695, %v1473_v40  ;;  %v1781_v40 = vld [vmem:[#allocation2 + $0x28] sm:$0xff] }
0x18a4   :  { %2670 = vpow2.f32 %v2227_v41 }
0x18b1   :  { %v2671_v42 = vpop.eup %2670 }
0x18b2   :  { %v1477_v21 = vadd.f32 1.0, %v2671_v42 }
0x18b4   :  { %2672 = vrcp.f32 %v1477_v21 }
0x18c1   :  { %v2673_v43 = vpop.eup %2672 }
0x18c2   :  { %v1492_v49 = vsub.f32 1.0, %v2673_v43  ;;  %v1498_v51 = vmul.f32 %v2673_v43, %v1396_v35 }
0x1914   :  { %v1483_v44 = vpop.permute.xlu0 %1482 }
0x1915   :  { %v1485_v45 = vmul.f32 %v2673_v43, %v1483_v44 }
0x1917   :  { %1487 = vrot.lane.b32.xlu1 %v1485_v45, %s2708_s11 }
0x1989   :  { %v1488_v46 = vpop.permute.xlu1 %1487 }
0x198a   :  { %v1490_v47 = vadd.f32 %v1488_v46, %v1472_v39 }
0x198c   :  { %2674 = vtanh.f32 %v1490_v47 }
0x1999   :  { %v2675_v48 = vpop.eup %2674 }
0x199a   :  { %1494 = vrot.lane.b32.xlu0 %v2675_v48, %s2709_s18 }
0x1a0c   :  { %v1495_v50 = vpop.permute.xlu0 %1494 }
0x1a0d   :  { %v1497_v52 = vmul.f32 %v1495_v50, %v1492_v49 }
0x1a0f   :  { %v1499_v54 = vadd.f32 %v1498_v51, %v1497_v52 }
0x1a11   :  { %1501 = vrot.lane.b32.xlu1 %v1499_v54, %s2709_s18 }
0x1a83   :  { %v1502_v55 = vpop.permute.xlu1 %1501 }
0x1a84   :  { %2538 = vmatmul.mubr.msk.f32.vlgmr.msra.gmra.mxu0 %vm179_vm3, %v1502_v55 }
0x1a85   :  { %2552 = vmatpush3.msra.mxu0 %v3003_v19  ;;  %2559 = vmatprep.mubr.msk.f32.mxu0 %vm2707_vm0, %v2706_v0 }
0x1a86   :  { %2553 = vmatprep.subr.mxu0 %v2706_v0 }
0x1a87   :  { %2554 = vmatpush3.msra.mxu0 %v3009_v20 }
0x1a88   :  { %2555 = vmatprep.subr.mxu0 %v2706_v0 }
0x1a89   :  { %2556 = vmatpush3.msra.mxu0 %v3016_v22 }
0x1a8a   :  { %2557 = vmatprep.subr.mxu0 %v2706_v0 }
0x1a8b   :  { %2558 = vmatpush3.msra.mxu0 %v3023_v23 }
0x1a8c   :  { %2573 = vmatprep.subr.mxu0 %v2706_v0 }
0x1b44   :  { %v1571_v56 = vpop.f32.mrf.mxu0 }
0x1b45   :  { %v1583_v57 = vadd.f32 %v1571_v56, %v3061_v31  ;;  %v1576_v59 = vadd.f32 %v1575_v16, %v1571_v56 }
0x1b46   :  { %v2539_v58 = vpop.f32.mrf.mxu0 }
0x1b47   :  { %1585 = vrot.lane.b32.xlu0 %v1583_v57, %s2708_s11  ;;  %v2229_v60 = vmul.f32 -1.442695, %v1576_v59  ;;  %v1884_v57 = vld [vmem:[#allocation2 + $0x30] sm:$0xff] }
0x1b49   :  { %2676 = vpow2.f32 %v2229_v60 }
0x1b56   :  { %v2677_v61 = vpop.eup %2676 }
0x1b57   :  { %v1580_v62 = vadd.f32 1.0, %v2677_v61 }
0x1b59   :  { %2678 = vrcp.f32 %v1580_v62 }
0x1b66   :  { %v2679_v63 = vpop.eup %2678 }
0x1b67   :  { %v1595_v10 = vsub.f32 1.0, %v2679_v63  ;;  %v1601_v12 = vmul.f32 %v2679_v63, %v1499_v54 }
0x1bb9   :  { %v1586_v1 = vpop.permute.xlu0 %1585 }
0x1bba   :  { %v1588_v3 = vmul.f32 %v2679_v63, %v1586_v1 }
0x1bbc   :  { %1590 = vrot.lane.b32.xlu1 %v1588_v3, %s2708_s11 }
0x1c2e   :  { %v1591_v5 = vpop.permute.xlu1 %1590 }
0x1c2f   :  { %v1593_v7 = vadd.f32 %v1591_v5, %v1575_v16 }
0x1c31   :  { %2680 = vtanh.f32 %v1593_v7 }
0x1c3e   :  { %v2681_v9 = vpop.eup %2680 }
0x1c3f   :  { %1597 = vrot.lane.b32.xlu0 %v2681_v9, %s2709_s18 }
0x1cb1   :  { %v1598_v11 = vpop.permute.xlu0 %1597 }
0x1cb2   :  { %v1600_v13 = vmul.f32 %v1598_v11, %v1595_v10 }
0x1cb4   :  { %v1602_v14 = vadd.f32 %v1601_v12, %v1600_v13 }
0x1cb6   :  { %1604 = vrot.lane.b32.xlu1 %v1602_v14, %s2709_s18 }
0x1d28   :  { %v1605_v15 = vpop.permute.xlu1 %1604 }
0x1d29   :  { %2549 = vmatmul.mubr.msk.f32.vlgmr.msra.gmra.mxu1 %vm179_vm3, %v1605_v15 }
0x1d2a   :  { %2563 = vmatpush3.msra.mxu1 %v3003_v19  ;;  %2570 = vmatprep.mubr.msk.f32.mxu1 %vm2707_vm0, %v2706_v0 }
0x1d2b   :  { %2564 = vmatprep.subr.mxu1 %v2706_v0 }
0x1d2c   :  { %2565 = vmatpush3.msra.mxu1 %v3009_v20 }
0x1d2d   :  { %2566 = vmatprep.subr.mxu1 %v2706_v0 }
0x1d2e   :  { %2567 = vmatpush3.msra.mxu1 %v3016_v22 }
0x1d2f   :  { %2568 = vmatprep.subr.mxu1 %v2706_v0 }
0x1d30   :  { %2569 = vmatpush3.msra.mxu1 %v3023_v23 }
0x1d31   :  { %2584 = vmatprep.subr.mxu1 %v2706_v0 }
0x1de9   :  { %v1674_v17 = vpop.f32.mrf.mxu1 }
0x1dea   :  { %v1686_v18 = vadd.f32 %v1674_v17, %v3061_v31  ;;  %v1679_v2 = vadd.f32 %v1678_v25, %v1674_v17 }
0x1deb   :  { %v2550_v24 = vpop.f32.mrf.mxu1 }
0x1dec   :  { %1688 = vrot.lane.b32.xlu0 %v1686_v18, %s2708_s11  ;;  %v2231_v26 = vmul.f32 -1.442695, %v1679_v2  ;;  %v1987_v18 = vld [vmem:[#allocation2 + $0x38] sm:$0xff] }
0x1dee   :  { %2682 = vpow2.f32 %v2231_v26 }
0x1dfb   :  { %v2683_v27 = vpop.eup %2682 }
0x1dfc   :  { %v1683_v28 = vadd.f32 1.0, %v2683_v27 }
0x1dfe   :  { %2684 = vrcp.f32 %v1683_v28 }
0x1e0b   :  { %v2685_v29 = vpop.eup %2684 }
0x1e0c   :  { %v1698_v33 = vsub.f32 1.0, %v2685_v29  ;;  %v1704_v35 = vmul.f32 %v2685_v29, %v1602_v14 }
0x1e5e   :  { %v1689_v4 = vpop.permute.xlu0 %1688 }
0x1e5f   :  { %v1691_v30 = vmul.f32 %v2685_v29, %v1689_v4 }
0x1e61   :  { %1693 = vrot.lane.b32.xlu1 %v1691_v30, %s2708_s11 }
0x1ed3   :  { %v1694_v6 = vpop.permute.xlu1 %1693 }
0x1ed4   :  { %v1696_v32 = vadd.f32 %v1694_v6, %v1678_v25  ;;  %v2017_v6 = vld [vmem:[%s3219_s1 + $0xb0] sm:$0xff] }
0x1ed6   :  { %2686 = vtanh.f32 %v1696_v32  ;;  %v2016_v32 = vld [vmem:[%s3219_s1 + $0xa8] sm:$0xff] }
0x1ee3   :  { %v2687_v8 = vpop.eup %2686 }
0x1ee4   :  { %1700 = vrot.lane.b32.xlu0 %v2687_v8, %s2709_s18  ;;  %v2015_v8 = vld [vmem:[%s3219_s1 + $0xa0] sm:$0xff] }
0x1f56   :  { %v1701_v34 = vpop.permute.xlu0 %1700 }
0x1f57   :  { %v1703_v36 = vmul.f32 %v1701_v34, %v1698_v33  ;;  %v2103_v34 = vld [vmem:[%s3219_s1 + $0xd8] sm:$0xff] }
0x1f59   :  { %v1705_v53 = vadd.f32 %v1704_v35, %v1703_v36 }
0x1f5b   :  { %1707 = vrot.lane.b32.xlu1 %v1705_v53, %s2709_s18 }
0x1fcd   :  { %v1708_v37 = vpop.permute.xlu1 %1707 }
0x1fce   :  { %2560 = vmatmul.mubr.msk.f32.vlgmr.msra.gmra.mxu0 %vm179_vm3, %v1708_v37 }
0x1fcf   :  { %2574 = vmatpush3.msra.mxu0 %v3003_v19  ;;  %2581 = vmatprep.mubr.msk.f32.mxu0 %vm2707_vm0, %v2706_v0 }
0x1fd0   :  { %2575 = vmatprep.subr.mxu0 %v2706_v0 }
0x1fd1   :  { %2576 = vmatpush3.msra.mxu0 %v3009_v20 }
0x1fd2   :  { %2577 = vmatprep.subr.mxu0 %v2706_v0 }
0x1fd3   :  { %2578 = vmatpush3.msra.mxu0 %v3016_v22 }
0x1fd4   :  { %2579 = vmatprep.subr.mxu0 %v2706_v0 }
0x1fd5   :  { %2580 = vmatpush3.msra.mxu0 %v3023_v23 }
0x1fd6   :  { %2595 = vmatprep.subr.mxu0 %v2706_v0 }
0x208e   :  { %v1777_v38 = vpop.f32.mrf.mxu0 }
0x208f   :  { %v1789_v19 = vadd.f32 %v1777_v38, %v3061_v31  ;;  %v1782_v41 = vadd.f32 %v1781_v40, %v1777_v38 }
0x2090   :  { %v2561_v39 = vpop.f32.mrf.mxu0 }
0x2091   :  { %1791 = vrot.lane.b32.xlu0 %v1789_v19, %s2708_s11  ;;  %v2233_v42 = vmul.f32 -1.442695, %v1782_v41  ;;  %v2102_v39 = vld [vmem:[%s3219_s1 + $0xd0] sm:$0xff]  ;;  %v2100_v41 = vld [vmem:[%s3219_s1 + $0xc0] sm:$0xff] }
0x2093   :  { %2688 = vpow2.f32 %v2233_v42  ;;  %v2238_v42 = vld [vmem:[%s3221_s2 + $0x4] ss:$0 sm:$0xff] }
0x20a0   :  { %v2689_v20 = vpop.eup %2688 }
0x20a1   :  { %v1786_v21 = vadd.f32 1.0, %v2689_v20 }
0x20a3   :  { %2690 = vrcp.f32 %v1786_v21 }
0x20b0   :  { %v2691_v22 = vpop.eup %2690 }
0x20b1   :  { %v1801_v47 = vsub.f32 1.0, %v2691_v22  ;;  %v1807_v49 = vmul.f32 %v2691_v22, %v1705_v53 }
0x2103   :  { %v1792_v43 = vpop.permute.xlu0 %1791 }
0x2104   :  { %v1794_v44 = vmul.f32 %v2691_v22, %v1792_v43 }
0x2106   :  { %1796 = vrot.lane.b32.xlu1 %v1794_v44, %s2708_s11  ;;  %v2240_v44 = vld [vmem:[%s3221_s2 + $0x5] ss:$0 sm:$0xff] }
0x2178   :  { %v1797_v23 = vpop.permute.xlu1 %1796 }
0x2179   :  { %v1799_v45 = vadd.f32 %v1797_v23, %v1781_v40  ;;  %v2101_v40 = vld [vmem:[%s3219_s1 + $0xc8] sm:$0xff] }
0x217b   :  { %2692 = vtanh.f32 %v1799_v45 }
0x2188   :  { %v2693_v46 = vpop.eup %2692 }
0x2189   :  { %1803 = vrot.lane.b32.xlu0 %v2693_v46, %s2709_s18 }
0x21fb   :  { %v1804_v48 = vpop.permute.xlu0 %1803 }
0x21fc   :  { %v1806_v50 = vmul.f32 %v1804_v48, %v1801_v47 }
0x21fe   :  { %v1808_v51 = vadd.f32 %v1807_v49, %v1806_v50 }
0x2200   :  { %1810 = vrot.lane.b32.xlu1 %v1808_v51, %s2709_s18 }
0x2272   :  { %v1811_v52 = vpop.permute.xlu1 %1810 }
0x2273   :  { %2571 = vmatmul.mubr.msk.f32.vlgmr.msra.gmra.mxu1 %vm179_vm3, %v1811_v52 }
0x2274   :  { %2592 = vmatprep.mubr.msk.f32.mxu1 %vm2707_vm0, %v2706_v0 }
0x2333   :  { %v1880_v54 = vpop.f32.mrf.mxu1 }
0x2334   :  { %v1892_v55 = vadd.f32 %v1880_v54, %v3061_v31  ;;  %v1885_v58 = vadd.f32 %v1884_v57, %v1880_v54 }
0x2335   :  { %v2572_v56 = vpop.f32.mrf.mxu1 }
0x2336   :  { %1894 = vrot.lane.b32.xlu0 %v1892_v55, %s2708_s11  ;;  %v2235_v16 = vmul.f32 -1.442695, %v1885_v58 }
0x2338   :  { %2694 = vpow2.f32 %v2235_v16 }
0x2345   :  { %v2695_v59 = vpop.eup %2694 }
0x2346   :  { %v1889_v60 = vadd.f32 1.0, %v2695_v59 }
0x2348   :  { %2696 = vrcp.f32 %v1889_v60 }
0x2355   :  { %v2697_v61 = vpop.eup %2696 }
0x2356   :  { %v1904_v7 = vsub.f32 1.0, %v2697_v61  ;;  %v1910_v10 = vmul.f32 %v2697_v61, %v1808_v51 }
0x23a8   :  { %v1895_v62 = vpop.permute.xlu0 %1894 }
0x23a9   :  { %v1897_v63 = vmul.f32 %v2697_v61, %v1895_v62 }
0x23ab   :  { %1899 = vrot.lane.b32.xlu1 %v1897_v63, %s2708_s11 }
0x241d   :  { %v1900_v1 = vpop.permute.xlu1 %1899 }
0x241e   :  { %v1902_v3 = vadd.f32 %v1900_v1, %v1884_v57 }
0x2420   :  { %2698 = vtanh.f32 %v1902_v3 }
0x242d   :  { %v2699_v5 = vpop.eup %2698 }
0x242e   :  { %1906 = vrot.lane.b32.xlu0 %v2699_v5, %s2709_s18 }
0x24a0   :  { %v1907_v9 = vpop.permute.xlu0 %1906 }
0x24a1   :  { %v1909_v11 = vmul.f32 %v1907_v9, %v1904_v7 }
0x24a3   :  { %v1911_v12 = vadd.f32 %v1910_v10, %v1909_v11 }
0x24a5   :  { %1913 = vrot.lane.b32.xlu1 %v1911_v12, %s2709_s18 }
0x2517   :  { %v1914_v13 = vpop.permute.xlu1 %1913 }
0x2518   :  { %2582 = vmatmul.mubr.msk.f32.vlgmr.msra.gmra.mxu0 %vm179_vm3, %v1914_v13 }
0x2519   :  { %2603 = vmatprep.mubr.msk.f32.mxu0 %vm2707_vm0, %v2706_v0  ;;  %2596 = vmatpush3.msra.mxu0 %v2103_v34 }
0x251a   :  { %2597 = vmatprep.subr.mxu0 %v2706_v0 }
0x251b   :  { %2598 = vmatpush3.msra.mxu0 %v2102_v39 }
0x251c   :  { %2599 = vmatprep.subr.mxu0 %v2706_v0 }
0x251d   :  { %2600 = vmatpush3.msra.mxu0 %v2101_v40 }
0x251e   :  { %2601 = vmatprep.subr.mxu0 %v2706_v0 }
0x251f   :  { %2602 = vmatpush3.msra.mxu0 %v2100_v41 }
0x25d8   :  { %v1983_v14 = vpop.f32.mrf.mxu0 }
0x25d9   :  { %v1995_v15 = vadd.f32 %v1983_v14, %v3061_v31  ;;  %v1988_v24 = vadd.f32 %v1987_v18, %v1983_v14  ;;  %v2018_v31 = vld [vmem:[%s3219_s1 + $0xb8] sm:$0xff] }
0x25da   :  { %v2583_v17 = vpop.f32.mrf.mxu0  ;;  %2585 = vmatpush3.msra.mxu1 %v2018_v31 }
0x25db   :  { %1997 = vrot.lane.b32.xlu0 %v1995_v15, %s2708_s11  ;;  %v2237_v25 = vmul.f32 -1.442695, %v1988_v24  ;;  %2586 = vmatprep.subr.mxu1 %v2706_v0 }
0x25dc   :  { %2587 = vmatpush3.msra.mxu1 %v2017_v6 }
0x25dd   :  { %2700 = vpow2.f32 %v2237_v25  ;;  %2588 = vmatprep.subr.mxu1 %v2706_v0 }
0x25de   :  { %2589 = vmatpush3.msra.mxu1 %v2016_v32 }
0x25df   :  { %2590 = vmatprep.subr.mxu1 %v2706_v0 }
0x25e0   :  { %2591 = vmatpush3.msra.mxu1 %v2015_v8 }
0x25ea   :  { %v2701_v2 = vpop.eup %2700 }
0x25eb   :  { %v1992_v26 = vadd.f32 1.0, %v2701_v2 }
0x25ed   :  { %2702 = vrcp.f32 %v1992_v26 }
0x25fa   :  { %v2703_v27 = vpop.eup %2702 }
0x25fb   :  { %v2007_v35 = vsub.f32 1.0, %v2703_v27  ;;  %v2013_v53 = vmul.f32 %v2703_v27, %v1911_v12 }
0x264d   :  { %v1998_v28 = vpop.permute.xlu0 %1997 }
0x264e   :  { %v2000_v29 = vmul.f32 %v2703_v27, %v1998_v28 }
0x2650   :  { %2002 = vrot.lane.b32.xlu1 %v2000_v29, %s2708_s11 }
0x26c2   :  { %v2003_v4 = vpop.permute.xlu1 %2002 }
0x26c3   :  { %v2005_v30 = vadd.f32 %v2003_v4, %v1987_v18 }
0x26c5   :  { %2704 = vtanh.f32 %v2005_v30 }
0x26d2   :  { %v2705_v33 = vpop.eup %2704 }
0x26d3   :  { %2009 = vrot.lane.b32.xlu0 %v2705_v33, %s2709_s18 }
0x2745   :  { %v2010_v36 = vpop.permute.xlu0 %2009 }
0x2746   :  { %v2012_v37 = vmul.f32 %v2010_v36, %v2007_v35 }
0x2748   :  { %v2014_v38 = vadd.f32 %v2013_v53, %v2012_v37 }
0x274a   :  { %2025 = vrot.lane.b32.xlu1 %v2014_v38, %s2709_s18 }
0x27bc   :  { %v2026_v19 = vpop.permute.xlu1 %2025 }
0x27bd   :  { %2593 = vmatmul.mubr.msk.f32.vlgmr.msra.gmra.mxu1 %vm179_vm3, %v2026_v19 }
0x287d   :  { %v2095_v20 = vpop.f32.mrf.mxu1 }
0x287e   :  { %v2096_v21 = vadd.f32 %v2238_v42, %v2095_v20 }
0x287f   :  { %v2594_v22 = vpop.f32.mrf.mxu1 }
0x2880   :  { %v2099_v43 = vmax.f32 %v2096_v21, 0.0 }
0x2882   :  { %2604 = vmatmul.mubr.msk.f32.vlgmr.msra.gmra.mxu0 %vm179_vm3, %v2099_v43 }
0x2942   :  { %v2178_v0 = vpop.f32.mrf.mxu0 }
0x2943   :  { %v2179_v23 = vadd.f32 %v2240_v44, %v2178_v0 }
0x2944   :  { %v2605_v45 = vpop.f32.mrf.mxu0 }
0x2945   :  { %2183 = vst.msk [vmem:[%s3222_s3] sm:$0x3] %vm2182_vm4, %v2179_v23 }

</bundles_post_ra>
